<compile_context>
chip_gen: v7x
topology: tpu7x:2x2x1
jax: 0.10.0
libtpu: 0.0.40
codegen_flags: <defaults>
</compile_context>

<pallas_src>
import functools

import jax
import jax.numpy as jnp
from jax.experimental import pallas as pl
from jax.experimental.pallas import tpu as pltpu

# ---------------- problem sizes (small, consistent with the module) ----------
C_IN = 4                      # input channels
H = W = 16                    # spatial
K = 3                         # conv kernel, padding=1 (SAME)
F1 = 32                       # conv output channels (shared-branch width)
D = 16                        # per-branch feature dim
HW = H * W
HP, WP = H + 2, W + 2         # zero-padded spatial extents
NPIX = HP * WP                # 324 flattened padded pixels per channel
NOUT = (H - 1) * WP + W       # 286 flattened output extent (keeps row padding)
TAPS = K * K
SHIFTS = tuple(kh * WP + kw for kh in range(K) for kw in range(K))


# ---------------- Pallas kernel ----------------------------------------------
def _siamese_kernel(x_ref, w1_ref, b1_ref, w2_ref, b2_ref, pool_ref, o_ref,
                    *, pairs_per_block):
    # x_ref   : (PB, 2*C_IN, NPIX) bf16  padded+flattened images, both branches
    # w1_ref  : (TAPS, F1, C_IN)   bf16  conv weights, one (F1, C) slab per tap
    # b1_ref  : (F1, 1)            f32   conv bias
    # w2_ref  : (D, F1)            bf16  classifier weight (PyTorch layout)
    # b2_ref  : (D, 1)             f32   classifier bias
    # pool_ref: (1, NOUT)          f32   1/HW on valid pixel lanes, 0 on junk
    # o_ref   : (PB, D, 2)         f32   per-pair feature columns
    b1 = b1_ref[...]
    b2 = b2_ref[...]
    pool = pool_ref[...]
    w2 = w2_ref[...].astype(jnp.float32)

    for p in range(pairs_per_block):
        for b in range(2):                       # the two shared-weight branches
            c0 = b * C_IN
            # Conv as 9 shifted matmuls with f32 accumulation (in-kernel im2col:
            # each tap is a static lane-offset slice of the flattened image).
            h = jnp.zeros((F1, NOUT), jnp.float32)
            for t, s in enumerate(SHIFTS):
                x_tap = x_ref[p, c0:c0 + C_IN, s:s + NOUT]          # (C, NOUT)
                h = h + jnp.dot(w1_ref[t], x_tap,
                                preferred_element_type=jnp.float32)  # (F1, NOUT)
            h = jnp.maximum(h + b1, 0.0)                             # bias + ReLU
            # Masked global-average-pool: precomputed scale vector + XLU reduce
            # (no in-kernel iota / selector matmul).
            pooled = jnp.sum(h * pool, axis=1, keepdims=True)        # (F1, 1)
            # Shared linear head.
            y = jnp.dot(w2, pooled,
                        preferred_element_type=jnp.float32) + b2     # (D, 1)
            o_ref[p, :, b:b + 1] = y.astype(o_ref.dtype)


def _siamese_pairs_pallas(x, w1, b1, w2, b2, pool, *, pairs_per_block):
    P = x.shape[0]
    pb = pairs_per_block
    assert P % pb == 0
    nblk = P // pb
    kernel = functools.partial(_siamese_kernel, pairs_per_block=pb)
    vmem = pltpu.MemorySpace.VMEM

    grid_spec = pltpu.PrefetchScalarGridSpec(
        num_scalar_prefetch=0,
        grid=(nblk,),
        in_specs=[
            pl.BlockSpec((pb, 2 * C_IN, NPIX), lambda i: (i, 0, 0),
                         memory_space=vmem),
            pl.BlockSpec((TAPS, F1, C_IN), lambda i: (0, 0, 0),
                         memory_space=vmem),
            pl.BlockSpec((F1, 1), lambda i: (0, 0), memory_space=vmem),
            pl.BlockSpec((D, F1), lambda i: (0, 0), memory_space=vmem),
            pl.BlockSpec((D, 1), lambda i: (0, 0), memory_space=vmem),
            pl.BlockSpec((1, NOUT), lambda i: (0, 0), memory_space=vmem),
        ],
        out_specs=pl.BlockSpec((pb, D, 2), lambda i: (i, 0, 0),
                               memory_space=vmem),
    )

    flops = int(P * 2 * (2 * TAPS * NOUT * C_IN * F1      # conv matmuls
                         + 2 * NOUT * F1                  # masked pooling
                         + 2 * D * F1))                   # classifier
    bytes_accessed = int(2 * x.size + 2 * (w1.size + w2.size)
                         + 4 * (b1.size + b2.size + pool.size) + 4 * P * D * 2)

    return pl.pallas_call(
        kernel,
        grid_spec=grid_spec,
        out_shape=jax.ShapeDtypeStruct((P, D, 2), jnp.float32),
        compiler_params=pltpu.CompilerParams(
            dimension_semantics=("parallel",)),
        cost_estimate=pl.CostEstimate(flops=flops, transcendentals=0,
                                      bytes_accessed=bytes_accessed),
    )(x, w1, b1, w2, b2, pool)


# ---------------- host glue (cheap: stack + pad + reshape only) --------------
def siamese2s_forward_pairs(x1, x2, params, *, pairs_per_block=2):
    # x1, x2: (P, C, H, W) -- P independent siamese pairs evaluated in one call.
    w_conv, b_conv, w_fc, b_fc = params
    P = x1.shape[0]
    pb = pairs_per_block if P % pairs_per_block == 0 else 1

    xs = jnp.stack([x1, x2], axis=1)                            # (P, 2, C, H, W)
    xs = jnp.pad(xs, ((0, 0), (0, 0), (0, 0), (1, 1), (1, 1)))  # SAME zero pad
    xs = xs.reshape(P, 2 * C_IN, NPIX).astype(jnp.bfloat16)     # compact slab

    w1 = w_conv.transpose(2, 3, 0, 1).reshape(TAPS, F1, C_IN).astype(jnp.bfloat16)
    b1 = b_conv.reshape(F1, 1).astype(jnp.float32)
    w2 = w_fc.astype(jnp.bfloat16)                              # (D, F1)
    b2 = b_fc.reshape(D, 1).astype(jnp.float32)

    lane = jnp.arange(NOUT, dtype=jnp.int32)
    pool = jnp.where(lane % WP < W, 1.0 / HW, 0.0).astype(jnp.float32)
    pool = pool.reshape(1, NOUT)

    out = _siamese_pairs_pallas(xs, w1, b1, w2, b2, pool, pairs_per_block=pb)
    # (P, D, 2) -> (P, 2*D): row p = [branch-1 features, branch-2 features]
    return out.transpose(0, 2, 1).reshape(P, 2 * D)


def siamese2s_forward(x1, x2, params):
    # Module semantics: one pair (batch=1) -> 1-D concatenated feature vector.
    return siamese2s_forward_pairs(x1, x2, params, pairs_per_block=1)[0]


# ---------------- pure-JAX reference (f32) -----------------------------------
def reference_forward_pairs(x1, x2, params):
    w_conv, b_conv, w_fc, b_fc = params

    def branch(x):
        y = jax.lax.conv_general_dilated(
            x, w_conv, window_strides=(1, 1), padding="SAME",
            dimension_numbers=("NCHW", "OIHW", "NCHW"))
        y = y + b_conv.reshape(1, F1, 1, 1)
        y = jnp.maximum(y, 0.0)
        y = jnp.mean(y, axis=(2, 3))                 # (P, F1)
        return y @ w_fc.T + b_fc                     # (P, D)

    return jnp.concatenate([branch(x1), branch(x2)], axis=1)   # (P, 2*D)


if __name__ == "__main__":
    key = jax.random.PRNGKey(0)
    k1, k2, k3, k4, k5, k6 = jax.random.split(key, 6)

    # deterministic synthetic parameters (shapes follow the PyTorch layers)
    w_conv = 0.1 * jax.random.normal(k1, (F1, C_IN, K, K), jnp.float32)
    b_conv = 0.1 * jax.random.normal(k2, (F1,), jnp.float32)
    w_fc = 0.1 * jax.random.normal(k3, (D, F1), jnp.float32)
    b_fc = 0.1 * jax.random.normal(k4, (D,), jnp.float32)
    params = (w_conv, b_conv, w_fc, b_fc)

    P = 8  # number of siamese pairs evaluated in one (parallel-grid) pallas_call
    x1 = jax.random.normal(k5, (P, C_IN, H, W), jnp.float32)
    x2 = jax.random.normal(k6, (P, C_IN, H, W), jnp.float32)

    fwd = jax.jit(functools.partial(siamese2s_forward_pairs, params=params,
                                    pairs_per_block=2))
    out = jax.block_until_ready(fwd(x1, x2))

    ref = reference_forward_pairs(x1, x2, params)
    assert out.shape == (P, 2 * D)
    # bf16 image/weight inputs (f32 accumulation) -> relaxed tolerance vs f32 ref
    assert jnp.allclose(out, ref, atol=2e-2, rtol=2e-2), (out, ref)

    # module-level semantics: a single pair -> 1-D concat of the two feature vecs
    fwd1 = jax.jit(functools.partial(siamese2s_forward, params=params))
    out1 = jax.block_until_ready(fwd1(x1[:1], x2[:1]))
    assert out1.shape == (2 * D,)
    assert jnp.allclose(out1, ref[0], atol=2e-2, rtol=2e-2), (out1, ref[0])

    print("KERNEL_OK")
</pallas_src>

<mosaic_0001>
module attributes {stable_mosaic.version = 11 : i64} {
  func.func @_siamese_kernel(%arg0: i32, %arg1: memref<2x8x324xbf16, #tpu.memory_space<vmem>>, %arg2: memref<9x32x4xbf16, #tpu.memory_space<vmem>>, %arg3: memref<32x1xf32, #tpu.memory_space<vmem>>, %arg4: memref<16x32xbf16, #tpu.memory_space<vmem>>, %arg5: memref<16x1xf32, #tpu.memory_space<vmem>>, %arg6: memref<1x286xf32, #tpu.memory_space<vmem>>, %arg7: memref<2x16x2xf32, #tpu.memory_space<vmem>>) attributes {dimension_semantics = [#tpu.dimension_semantics<parallel>], iteration_bounds = array<i64: 4>, scalar_prefetch = 0 : i64, scratch_operands = 0 : i64, tpu.core_type = #tpu.core_type<tc>, window_params = [{transform_indices = @transform_0, window_bounds = array<i64: 2, 8, 324>}, {pipeline_mode = #tpu.pipeline_mode<synchronous>, transform_indices = @transform_1, window_bounds = array<i64: 9, 32, 4>}, {pipeline_mode = #tpu.pipeline_mode<synchronous>, transform_indices = @transform_2, window_bounds = array<i64: 32, 1>}, {pipeline_mode = #tpu.pipeline_mode<synchronous>, transform_indices = @transform_3, window_bounds = array<i64: 16, 32>}, {pipeline_mode = #tpu.pipeline_mode<synchronous>, transform_indices = @transform_4, window_bounds = array<i64: 16, 1>}, {pipeline_mode = #tpu.pipeline_mode<synchronous>, transform_indices = @transform_5, window_bounds = array<i64: 1, 286>}, {transform_indices = @transform_6, window_bounds = array<i64: 2, 16, 2>}]} {
    %c0 = arith.constant 0 : index
    %c0_0 = arith.constant 0 : index
    %0 = vector.load %arg3[%c0, %c0_0] : memref<32x1xf32, #tpu.memory_space<vmem>>, vector<32x1xf32>
    %c0_1 = arith.constant 0 : index
    %c0_2 = arith.constant 0 : index
    %1 = vector.load %arg5[%c0_1, %c0_2] : memref<16x1xf32, #tpu.memory_space<vmem>>, vector<16x1xf32>
    %c0_3 = arith.constant 0 : index
    %c0_4 = arith.constant 0 : index
    %2 = vector.load %arg6[%c0_3, %c0_4] : memref<1x286xf32, #tpu.memory_space<vmem>>, vector<1x286xf32>
    %c0_5 = arith.constant 0 : index
    %c0_6 = arith.constant 0 : index
    %3 = vector.load %arg4[%c0_5, %c0_6] : memref<16x32xbf16, #tpu.memory_space<vmem>>, vector<16x32xbf16>
    %4 = arith.extf %3 : vector<16x32xbf16> to vector<16x32xf32>
    %cst = arith.constant 0.000000e+00 : f32
    %5 = vector.broadcast %cst : f32 to vector<32x286xf32>
    %c0_7 = arith.constant 0 : index
    %c0_8 = arith.constant 0 : index
    %c0_9 = arith.constant 0 : index
    %6 = vector.load %arg1[%c0_7, %c0_8, %c0_9] : memref<2x8x324xbf16, #tpu.memory_space<vmem>>, vector<1x4x286xbf16>
    %7 = vector.shape_cast %6 : vector<1x4x286xbf16> to vector<4x286xbf16>
    %c0_10 = arith.constant 0 : index
    %c0_11 = arith.constant 0 : index
    %c0_12 = arith.constant 0 : index
    %8 = vector.load %arg2[%c0_10, %c0_11, %c0_12] : memref<9x32x4xbf16, #tpu.memory_space<vmem>>, vector<1x32x4xbf16>
    %9 = vector.shape_cast %8 : vector<1x32x4xbf16> to vector<32x4xbf16>
    %cst_13 = arith.constant dense<0.000000e+00> : vector<32x286xf32>
    %10 = tpu.matmul %9, %7, %cst_13 {dimension_numbers = #tpu.dot_dimension_numbers<[1], [0], [0], [1], [0, 0, 1, 1], [], []>} : vector<32x4xbf16>, vector<4x286xbf16>, vector<32x286xf32> -> vector<32x286xf32>
    %11 = arith.addf %5, %10 : vector<32x286xf32>
    %c0_14 = arith.constant 0 : index
    %c0_15 = arith.constant 0 : index
    %c1 = arith.constant 1 : index
    %12 = vector.load %arg1[%c0_14, %c0_15, %c1] : memref<2x8x324xbf16, #tpu.memory_space<vmem>>, vector<1x4x286xbf16>
    %13 = vector.shape_cast %12 : vector<1x4x286xbf16> to vector<4x286xbf16>
    %c1_16 = arith.constant 1 : index
    %c0_17 = arith.constant 0 : index
    %c0_18 = arith.constant 0 : index
    %14 = vector.load %arg2[%c1_16, %c0_17, %c0_18] : memref<9x32x4xbf16, #tpu.memory_space<vmem>>, vector<1x32x4xbf16>
    %15 = vector.shape_cast %14 : vector<1x32x4xbf16> to vector<32x4xbf16>
    %cst_19 = arith.constant dense<0.000000e+00> : vector<32x286xf32>
    %16 = tpu.matmul %15, %13, %cst_19 {dimension_numbers = #tpu.dot_dimension_numbers<[1], [0], [0], [1], [0, 0, 1, 1], [], []>} : vector<32x4xbf16>, vector<4x286xbf16>, vector<32x286xf32> -> vector<32x286xf32>
    %17 = arith.addf %11, %16 : vector<32x286xf32>
    %c0_20 = arith.constant 0 : index
    %c0_21 = arith.constant 0 : index
    %c2 = arith.constant 2 : index
    %18 = vector.load %arg1[%c0_20, %c0_21, %c2] : memref<2x8x324xbf16, #tpu.memory_space<vmem>>, vector<1x4x286xbf16>
    %19 = vector.shape_cast %18 : vector<1x4x286xbf16> to vector<4x286xbf16>
    %c2_22 = arith.constant 2 : index
    %c0_23 = arith.constant 0 : index
    %c0_24 = arith.constant 0 : index
    %20 = vector.load %arg2[%c2_22, %c0_23, %c0_24] : memref<9x32x4xbf16, #tpu.memory_space<vmem>>, vector<1x32x4xbf16>
    %21 = vector.shape_cast %20 : vector<1x32x4xbf16> to vector<32x4xbf16>
    %cst_25 = arith.constant dense<0.000000e+00> : vector<32x286xf32>
    %22 = tpu.matmul %21, %19, %cst_25 {dimension_numbers = #tpu.dot_dimension_numbers<[1], [0], [0], [1], [0, 0, 1, 1], [], []>} : vector<32x4xbf16>, vector<4x286xbf16>, vector<32x286xf32> -> vector<32x286xf32>
    %23 = arith.addf %17, %22 : vector<32x286xf32>
    %c0_26 = arith.constant 0 : index
    %c0_27 = arith.constant 0 : index
    %c18 = arith.constant 18 : index
    %24 = vector.load %arg1[%c0_26, %c0_27, %c18] : memref<2x8x324xbf16, #tpu.memory_space<vmem>>, vector<1x4x286xbf16>
    %25 = vector.shape_cast %24 : vector<1x4x286xbf16> to vector<4x286xbf16>
    %c3 = arith.constant 3 : index
    %c0_28 = arith.constant 0 : index
    %c0_29 = arith.constant 0 : index
    %26 = vector.load %arg2[%c3, %c0_28, %c0_29] : memref<9x32x4xbf16, #tpu.memory_space<vmem>>, vector<1x32x4xbf16>
    %27 = vector.shape_cast %26 : vector<1x32x4xbf16> to vector<32x4xbf16>
    %cst_30 = arith.constant dense<0.000000e+00> : vector<32x286xf32>
    %28 = tpu.matmul %27, %25, %cst_30 {dimension_numbers = #tpu.dot_dimension_numbers<[1], [0], [0], [1], [0, 0, 1, 1], [], []>} : vector<32x4xbf16>, vector<4x286xbf16>, vector<32x286xf32> -> vector<32x286xf32>
    %29 = arith.addf %23, %28 : vector<32x286xf32>
    %c0_31 = arith.constant 0 : index
    %c0_32 = arith.constant 0 : index
    %c19 = arith.constant 19 : index
    %30 = vector.load %arg1[%c0_31, %c0_32, %c19] : memref<2x8x324xbf16, #tpu.memory_space<vmem>>, vector<1x4x286xbf16>
    %31 = vector.shape_cast %30 : vector<1x4x286xbf16> to vector<4x286xbf16>
    %c4 = arith.constant 4 : index
    %c0_33 = arith.constant 0 : index
    %c0_34 = arith.constant 0 : index
    %32 = vector.load %arg2[%c4, %c0_33, %c0_34] : memref<9x32x4xbf16, #tpu.memory_space<vmem>>, vector<1x32x4xbf16>
    %33 = vector.shape_cast %32 : vector<1x32x4xbf16> to vector<32x4xbf16>
    %cst_35 = arith.constant dense<0.000000e+00> : vector<32x286xf32>
    %34 = tpu.matmul %33, %31, %cst_35 {dimension_numbers = #tpu.dot_dimension_numbers<[1], [0], [0], [1], [0, 0, 1, 1], [], []>} : vector<32x4xbf16>, vector<4x286xbf16>, vector<32x286xf32> -> vector<32x286xf32>
    %35 = arith.addf %29, %34 : vector<32x286xf32>
    %c0_36 = arith.constant 0 : index
    %c0_37 = arith.constant 0 : index
    %c20 = arith.constant 20 : index
    %36 = vector.load %arg1[%c0_36, %c0_37, %c20] : memref<2x8x324xbf16, #tpu.memory_space<vmem>>, vector<1x4x286xbf16>
    %37 = vector.shape_cast %36 : vector<1x4x286xbf16> to vector<4x286xbf16>
    %c5 = arith.constant 5 : index
    %c0_38 = arith.constant 0 : index
    %c0_39 = arith.constant 0 : index
    %38 = vector.load %arg2[%c5, %c0_38, %c0_39] : memref<9x32x4xbf16, #tpu.memory_space<vmem>>, vector<1x32x4xbf16>
    %39 = vector.shape_cast %38 : vector<1x32x4xbf16> to vector<32x4xbf16>
    %cst_40 = arith.constant dense<0.000000e+00> : vector<32x286xf32>
    %40 = tpu.matmul %39, %37, %cst_40 {dimension_numbers = #tpu.dot_dimension_numbers<[1], [0], [0], [1], [0, 0, 1, 1], [], []>} : vector<32x4xbf16>, vector<4x286xbf16>, vector<32x286xf32> -> vector<32x286xf32>
    %41 = arith.addf %35, %40 : vector<32x286xf32>
    %c0_41 = arith.constant 0 : index
    %c0_42 = arith.constant 0 : index
    %c36 = arith.constant 36 : index
    %42 = vector.load %arg1[%c0_41, %c0_42, %c36] : memref<2x8x324xbf16, #tpu.memory_space<vmem>>, vector<1x4x286xbf16>
    %43 = vector.shape_cast %42 : vector<1x4x286xbf16> to vector<4x286xbf16>
    %c6 = arith.constant 6 : index
    %c0_43 = arith.constant 0 : index
    %c0_44 = arith.constant 0 : index
    %44 = vector.load %arg2[%c6, %c0_43, %c0_44] : memref<9x32x4xbf16, #tpu.memory_space<vmem>>, vector<1x32x4xbf16>
    %45 = vector.shape_cast %44 : vector<1x32x4xbf16> to vector<32x4xbf16>
    %cst_45 = arith.constant dense<0.000000e+00> : vector<32x286xf32>
    %46 = tpu.matmul %45, %43, %cst_45 {dimension_numbers = #tpu.dot_dimension_numbers<[1], [0], [0], [1], [0, 0, 1, 1], [], []>} : vector<32x4xbf16>, vector<4x286xbf16>, vector<32x286xf32> -> vector<32x286xf32>
    %47 = arith.addf %41, %46 : vector<32x286xf32>
    %c0_46 = arith.constant 0 : index
    %c0_47 = arith.constant 0 : index
    %c37 = arith.constant 37 : index
    %48 = vector.load %arg1[%c0_46, %c0_47, %c37] : memref<2x8x324xbf16, #tpu.memory_space<vmem>>, vector<1x4x286xbf16>
    %49 = vector.shape_cast %48 : vector<1x4x286xbf16> to vector<4x286xbf16>
    %c7 = arith.constant 7 : index
    %c0_48 = arith.constant 0 : index
    %c0_49 = arith.constant 0 : index
    %50 = vector.load %arg2[%c7, %c0_48, %c0_49] : memref<9x32x4xbf16, #tpu.memory_space<vmem>>, vector<1x32x4xbf16>
    %51 = vector.shape_cast %50 : vector<1x32x4xbf16> to vector<32x4xbf16>
    %cst_50 = arith.constant dense<0.000000e+00> : vector<32x286xf32>
    %52 = tpu.matmul %51, %49, %cst_50 {dimension_numbers = #tpu.dot_dimension_numbers<[1], [0], [0], [1], [0, 0, 1, 1], [], []>} : vector<32x4xbf16>, vector<4x286xbf16>, vector<32x286xf32> -> vector<32x286xf32>
    %53 = arith.addf %47, %52 : vector<32x286xf32>
    %c0_51 = arith.constant 0 : index
    %c0_52 = arith.constant 0 : index
    %c38 = arith.constant 38 : index
    %54 = vector.load %arg1[%c0_51, %c0_52, %c38] : memref<2x8x324xbf16, #tpu.memory_space<vmem>>, vector<1x4x286xbf16>
    %55 = vector.shape_cast %54 : vector<1x4x286xbf16> to vector<4x286xbf16>
    %c8 = arith.constant 8 : index
    %c0_53 = arith.constant 0 : index
    %c0_54 = arith.constant 0 : index
    %56 = vector.load %arg2[%c8, %c0_53, %c0_54] : memref<9x32x4xbf16, #tpu.memory_space<vmem>>, vector<1x32x4xbf16>
    %57 = vector.shape_cast %56 : vector<1x32x4xbf16> to vector<32x4xbf16>
    %cst_55 = arith.constant dense<0.000000e+00> : vector<32x286xf32>
    %58 = tpu.matmul %57, %55, %cst_55 {dimension_numbers = #tpu.dot_dimension_numbers<[1], [0], [0], [1], [0, 0, 1, 1], [], []>} : vector<32x4xbf16>, vector<4x286xbf16>, vector<32x286xf32> -> vector<32x286xf32>
    %59 = arith.addf %53, %58 : vector<32x286xf32>
    %60 = vector.broadcast %0 : vector<32x1xf32> to vector<32x286xf32>
    %61 = arith.addf %59, %60 : vector<32x286xf32>
    %cst_56 = arith.constant 0.000000e+00 : f32
    %62 = vector.broadcast %cst_56 : f32 to vector<32x286xf32>
    %63 = arith.maximumf %61, %62 : vector<32x286xf32>
    %64 = vector.broadcast %2 : vector<1x286xf32> to vector<32x286xf32>
    %65 = arith.mulf %63, %64 : vector<32x286xf32>
    %cst_57 = arith.constant dense<0.000000e+00> : vector<32xf32>
    %66 = vector.multi_reduction <add>, %65, %cst_57 [1] : vector<32x286xf32> to vector<32xf32>
    %67 = vector.shape_cast %66 : vector<32xf32> to vector<32x1xf32>
    %cst_58 = arith.constant dense<0.000000e+00> : vector<16x1xf32>
    %68 = tpu.matmul %4, %67, %cst_58 {dimension_numbers = #tpu.dot_dimension_numbers<[1], [0], [0], [1], [0, 0, 1, 1], [], []>} : vector<16x32xf32>, vector<32x1xf32>, vector<16x1xf32> -> vector<16x1xf32>
    %69 = arith.addf %68, %1 : vector<16x1xf32>
    %c0_59 = arith.constant 0 : index
    %c0_60 = arith.constant 0 : index
    %c0_61 = arith.constant 0 : index
    %70 = vector.load %arg7[%c0_59, %c0_60, %c0_61] : memref<2x16x2xf32, #tpu.memory_space<vmem>>, vector<1x16x1xf32>
    %71 = vector.shape_cast %70 : vector<1x16x1xf32> to vector<16x1xf32>
    %72 = vector.shape_cast %69 : vector<16x1xf32> to vector<1x16x1xf32>
    tpu.vector_store %arg7[%c0_59, %c0_60, %c0_61], %72 {strides = array<i32>} : memref<2x16x2xf32, #tpu.memory_space<vmem>>, vector<1x16x1xf32>,
    %cst_62 = arith.constant 0.000000e+00 : f32
    %73 = vector.broadcast %cst_62 : f32 to vector<32x286xf32>
    %c0_63 = arith.constant 0 : index
    %c4_64 = arith.constant 4 : index
    %c0_65 = arith.constant 0 : index
    %74 = vector.load %arg1[%c0_63, %c4_64, %c0_65] : memref<2x8x324xbf16, #tpu.memory_space<vmem>>, vector<1x4x286xbf16>
    %75 = vector.shape_cast %74 : vector<1x4x286xbf16> to vector<4x286xbf16>
    %c0_66 = arith.constant 0 : index
    %c0_67 = arith.constant 0 : index
    %c0_68 = arith.constant 0 : index
    %76 = vector.load %arg2[%c0_66, %c0_67, %c0_68] : memref<9x32x4xbf16, #tpu.memory_space<vmem>>, vector<1x32x4xbf16>
    %77 = vector.shape_cast %76 : vector<1x32x4xbf16> to vector<32x4xbf16>
    %cst_69 = arith.constant dense<0.000000e+00> : vector<32x286xf32>
    %78 = tpu.matmul %77, %75, %cst_69 {dimension_numbers = #tpu.dot_dimension_numbers<[1], [0], [0], [1], [0, 0, 1, 1], [], []>} : vector<32x4xbf16>, vector<4x286xbf16>, vector<32x286xf32> -> vector<32x286xf32>
    %79 = arith.addf %73, %78 : vector<32x286xf32>
    %c0_70 = arith.constant 0 : index
    %c4_71 = arith.constant 4 : index
    %c1_72 = arith.constant 1 : index
    %80 = vector.load %arg1[%c0_70, %c4_71, %c1_72] : memref<2x8x324xbf16, #tpu.memory_space<vmem>>, vector<1x4x286xbf16>
    %81 = vector.shape_cast %80 : vector<1x4x286xbf16> to vector<4x286xbf16>
    %c1_73 = arith.constant 1 : index
    %c0_74 = arith.constant 0 : index
    %c0_75 = arith.constant 0 : index
    %82 = vector.load %arg2[%c1_73, %c0_74, %c0_75] : memref<9x32x4xbf16, #tpu.memory_space<vmem>>, vector<1x32x4xbf16>
    %83 = vector.shape_cast %82 : vector<1x32x4xbf16> to vector<32x4xbf16>
    %cst_76 = arith.constant dense<0.000000e+00> : vector<32x286xf32>
    %84 = tpu.matmul %83, %81, %cst_76 {dimension_numbers = #tpu.dot_dimension_numbers<[1], [0], [0], [1], [0, 0, 1, 1], [], []>} : vector<32x4xbf16>, vector<4x286xbf16>, vector<32x286xf32> -> vector<32x286xf32>
    %85 = arith.addf %79, %84 : vector<32x286xf32>
    %c0_77 = arith.constant 0 : index
    %c4_78 = arith.constant 4 : index
    %c2_79 = arith.constant 2 : index
    %86 = vector.load %arg1[%c0_77, %c4_78, %c2_79] : memref<2x8x324xbf16, #tpu.memory_space<vmem>>, vector<1x4x286xbf16>
    %87 = vector.shape_cast %86 : vector<1x4x286xbf16> to vector<4x286xbf16>
    %c2_80 = arith.constant 2 : index
    %c0_81 = arith.constant 0 : index
    %c0_82 = arith.constant 0 : index
    %88 = vector.load %arg2[%c2_80, %c0_81, %c0_82] : memref<9x32x4xbf16, #tpu.memory_space<vmem>>, vector<1x32x4xbf16>
    %89 = vector.shape_cast %88 : vector<1x32x4xbf16> to vector<32x4xbf16>
    %cst_83 = arith.constant dense<0.000000e+00> : vector<32x286xf32>
    %90 = tpu.matmul %89, %87, %cst_83 {dimension_numbers = #tpu.dot_dimension_numbers<[1], [0], [0], [1], [0, 0, 1, 1], [], []>} : vector<32x4xbf16>, vector<4x286xbf16>, vector<32x286xf32> -> vector<32x286xf32>
    %91 = arith.addf %85, %90 : vector<32x286xf32>
    %c0_84 = arith.constant 0 : index
    %c4_85 = arith.constant 4 : index
    %c18_86 = arith.constant 18 : index
    %92 = vector.load %arg1[%c0_84, %c4_85, %c18_86] : memref<2x8x324xbf16, #tpu.memory_space<vmem>>, vector<1x4x286xbf16>
    %93 = vector.shape_cast %92 : vector<1x4x286xbf16> to vector<4x286xbf16>
    %c3_87 = arith.constant 3 : index
    %c0_88 = arith.constant 0 : index
    %c0_89 = arith.constant 0 : index
    %94 = vector.load %arg2[%c3_87, %c0_88, %c0_89] : memref<9x32x4xbf16, #tpu.memory_space<vmem>>, vector<1x32x4xbf16>
    %95 = vector.shape_cast %94 : vector<1x32x4xbf16> to vector<32x4xbf16>
    %cst_90 = arith.constant dense<0.000000e+00> : vector<32x286xf32>
    %96 = tpu.matmul %95, %93, %cst_90 {dimension_numbers = #tpu.dot_dimension_numbers<[1], [0], [0], [1], [0, 0, 1, 1], [], []>} : vector<32x4xbf16>, vector<4x286xbf16>, vector<32x286xf32> -> vector<32x286xf32>
    %97 = arith.addf %91, %96 : vector<32x286xf32>
    %c0_91 = arith.constant 0 : index
    %c4_92 = arith.constant 4 : index
    %c19_93 = arith.constant 19 : index
    %98 = vector.load %arg1[%c0_91, %c4_92, %c19_93] : memref<2x8x324xbf16, #tpu.memory_space<vmem>>, vector<1x4x286xbf16>
    %99 = vector.shape_cast %98 : vector<1x4x286xbf16> to vector<4x286xbf16>
    %c4_94 = arith.constant 4 : index
    %c0_95 = arith.constant 0 : index
    %c0_96 = arith.constant 0 : index
    %100 = vector.load %arg2[%c4_94, %c0_95, %c0_96] : memref<9x32x4xbf16, #tpu.memory_space<vmem>>, vector<1x32x4xbf16>
    %101 = vector.shape_cast %100 : vector<1x32x4xbf16> to vector<32x4xbf16>
    %cst_97 = arith.constant dense<0.000000e+00> : vector<32x286xf32>
    %102 = tpu.matmul %101, %99, %cst_97 {dimension_numbers = #tpu.dot_dimension_numbers<[1], [0], [0], [1], [0, 0, 1, 1], [], []>} : vector<32x4xbf16>, vector<4x286xbf16>, vector<32x286xf32> -> vector<32x286xf32>
    %103 = arith.addf %97, %102 : vector<32x286xf32>
    %c0_98 = arith.constant 0 : index
    %c4_99 = arith.constant 4 : index
    %c20_100 = arith.constant 20 : index
    %104 = vector.load %arg1[%c0_98, %c4_99, %c20_100] : memref<2x8x324xbf16, #tpu.memory_space<vmem>>, vector<1x4x286xbf16>
    %105 = vector.shape_cast %104 : vector<1x4x286xbf16> to vector<4x286xbf16>
    %c5_101 = arith.constant 5 : index
    %c0_102 = arith.constant 0 : index
    %c0_103 = arith.constant 0 : index
    %106 = vector.load %arg2[%c5_101, %c0_102, %c0_103] : memref<9x32x4xbf16, #tpu.memory_space<vmem>>, vector<1x32x4xbf16>
    %107 = vector.shape_cast %106 : vector<1x32x4xbf16> to vector<32x4xbf16>
    %cst_104 = arith.constant dense<0.000000e+00> : vector<32x286xf32>
    %108 = tpu.matmul %107, %105, %cst_104 {dimension_numbers = #tpu.dot_dimension_numbers<[1], [0], [0], [1], [0, 0, 1, 1], [], []>} : vector<32x4xbf16>, vector<4x286xbf16>, vector<32x286xf32> -> vector<32x286xf32>
    %109 = arith.addf %103, %108 : vector<32x286xf32>
    %c0_105 = arith.constant 0 : index
    %c4_106 = arith.constant 4 : index
    %c36_107 = arith.constant 36 : index
    %110 = vector.load %arg1[%c0_105, %c4_106, %c36_107] : memref<2x8x324xbf16, #tpu.memory_space<vmem>>, vector<1x4x286xbf16>
    %111 = vector.shape_cast %110 : vector<1x4x286xbf16> to vector<4x286xbf16>
    %c6_108 = arith.constant 6 : index
    %c0_109 = arith.constant 0 : index
    %c0_110 = arith.constant 0 : index
    %112 = vector.load %arg2[%c6_108, %c0_109, %c0_110] : memref<9x32x4xbf16, #tpu.memory_space<vmem>>, vector<1x32x4xbf16>
    %113 = vector.shape_cast %112 : vector<1x32x4xbf16> to vector<32x4xbf16>
    %cst_111 = arith.constant dense<0.000000e+00> : vector<32x286xf32>
    %114 = tpu.matmul %113, %111, %cst_111 {dimension_numbers = #tpu.dot_dimension_numbers<[1], [0], [0], [1], [0, 0, 1, 1], [], []>} : vector<32x4xbf16>, vector<4x286xbf16>, vector<32x286xf32> -> vector<32x286xf32>
    %115 = arith.addf %109, %114 : vector<32x286xf32>
    %c0_112 = arith.constant 0 : index
    %c4_113 = arith.constant 4 : index
    %c37_114 = arith.constant 37 : index
    %116 = vector.load %arg1[%c0_112, %c4_113, %c37_114] : memref<2x8x324xbf16, #tpu.memory_space<vmem>>, vector<1x4x286xbf16>
    %117 = vector.shape_cast %116 : vector<1x4x286xbf16> to vector<4x286xbf16>
    %c7_115 = arith.constant 7 : index
    %c0_116 = arith.constant 0 : index
    %c0_117 = arith.constant 0 : index
    %118 = vector.load %arg2[%c7_115, %c0_116, %c0_117] : memref<9x32x4xbf16, #tpu.memory_space<vmem>>, vector<1x32x4xbf16>
    %119 = vector.shape_cast %118 : vector<1x32x4xbf16> to vector<32x4xbf16>
    %cst_118 = arith.constant dense<0.000000e+00> : vector<32x286xf32>
    %120 = tpu.matmul %119, %117, %cst_118 {dimension_numbers = #tpu.dot_dimension_numbers<[1], [0], [0], [1], [0, 0, 1, 1], [], []>} : vector<32x4xbf16>, vector<4x286xbf16>, vector<32x286xf32> -> vector<32x286xf32>
    %121 = arith.addf %115, %120 : vector<32x286xf32>
    %c0_119 = arith.constant 0 : index
    %c4_120 = arith.constant 4 : index
    %c38_121 = arith.constant 38 : index
    %122 = vector.load %arg1[%c0_119, %c4_120, %c38_121] : memref<2x8x324xbf16, #tpu.memory_space<vmem>>, vector<1x4x286xbf16>
    %123 = vector.shape_cast %122 : vector<1x4x286xbf16> to vector<4x286xbf16>
    %c8_122 = arith.constant 8 : index
    %c0_123 = arith.constant 0 : index
    %c0_124 = arith.constant 0 : index
    %124 = vector.load %arg2[%c8_122, %c0_123, %c0_124] : memref<9x32x4xbf16, #tpu.memory_space<vmem>>, vector<1x32x4xbf16>
    %125 = vector.shape_cast %124 : vector<1x32x4xbf16> to vector<32x4xbf16>
    %cst_125 = arith.constant dense<0.000000e+00> : vector<32x286xf32>
    %126 = tpu.matmul %125, %123, %cst_125 {dimension_numbers = #tpu.dot_dimension_numbers<[1], [0], [0], [1], [0, 0, 1, 1], [], []>} : vector<32x4xbf16>, vector<4x286xbf16>, vector<32x286xf32> -> vector<32x286xf32>
    %127 = arith.addf %121, %126 : vector<32x286xf32>
    %128 = vector.broadcast %0 : vector<32x1xf32> to vector<32x286xf32>
    %129 = arith.addf %127, %128 : vector<32x286xf32>
    %cst_126 = arith.constant 0.000000e+00 : f32
    %130 = vector.broadcast %cst_126 : f32 to vector<32x286xf32>
    %131 = arith.maximumf %129, %130 : vector<32x286xf32>
    %132 = vector.broadcast %2 : vector<1x286xf32> to vector<32x286xf32>
    %133 = arith.mulf %131, %132 : vector<32x286xf32>
    %cst_127 = arith.constant dense<0.000000e+00> : vector<32xf32>
    %134 = vector.multi_reduction <add>, %133, %cst_127 [1] : vector<32x286xf32> to vector<32xf32>
    %135 = vector.shape_cast %134 : vector<32xf32> to vector<32x1xf32>
    %cst_128 = arith.constant dense<0.000000e+00> : vector<16x1xf32>
    %136 = tpu.matmul %4, %135, %cst_128 {dimension_numbers = #tpu.dot_dimension_numbers<[1], [0], [0], [1], [0, 0, 1, 1], [], []>} : vector<16x32xf32>, vector<32x1xf32>, vector<16x1xf32> -> vector<16x1xf32>
    %137 = arith.addf %136, %1 : vector<16x1xf32>
    %c0_129 = arith.constant 0 : index
    %c0_130 = arith.constant 0 : index
    %c1_131 = arith.constant 1 : index
    %138 = vector.load %arg7[%c0_129, %c0_130, %c1_131] : memref<2x16x2xf32, #tpu.memory_space<vmem>>, vector<1x16x1xf32>
    %139 = vector.shape_cast %138 : vector<1x16x1xf32> to vector<16x1xf32>
    %140 = vector.shape_cast %137 : vector<16x1xf32> to vector<1x16x1xf32>
    tpu.vector_store %arg7[%c0_129, %c0_130, %c1_131], %140 {strides = array<i32>} : memref<2x16x2xf32, #tpu.memory_space<vmem>>, vector<1x16x1xf32>,
    %cst_132 = arith.constant 0.000000e+00 : f32
    %141 = vector.broadcast %cst_132 : f32 to vector<32x286xf32>
    %c1_133 = arith.constant 1 : index
    %c0_134 = arith.constant 0 : index
    %c0_135 = arith.constant 0 : index
    %142 = vector.load %arg1[%c1_133, %c0_134, %c0_135] : memref<2x8x324xbf16, #tpu.memory_space<vmem>>, vector<1x4x286xbf16>
    %143 = vector.shape_cast %142 : vector<1x4x286xbf16> to vector<4x286xbf16>
    %c0_136 = arith.constant 0 : index
    %c0_137 = arith.constant 0 : index
    %c0_138 = arith.constant 0 : index
    %144 = vector.load %arg2[%c0_136, %c0_137, %c0_138] : memref<9x32x4xbf16, #tpu.memory_space<vmem>>, vector<1x32x4xbf16>
    %145 = vector.shape_cast %144 : vector<1x32x4xbf16> to vector<32x4xbf16>
    %cst_139 = arith.constant dense<0.000000e+00> : vector<32x286xf32>
    %146 = tpu.matmul %145, %143, %cst_139 {dimension_numbers = #tpu.dot_dimension_numbers<[1], [0], [0], [1], [0, 0, 1, 1], [], []>} : vector<32x4xbf16>, vector<4x286xbf16>, vector<32x286xf32> -> vector<32x286xf32>
    %147 = arith.addf %141, %146 : vector<32x286xf32>
    %c1_140 = arith.constant 1 : index
    %c0_141 = arith.constant 0 : index
    %c1_142 = arith.constant 1 : index
    %148 = vector.load %arg1[%c1_140, %c0_141, %c1_142] : memref<2x8x324xbf16, #tpu.memory_space<vmem>>, vector<1x4x286xbf16>
    %149 = vector.shape_cast %148 : vector<1x4x286xbf16> to vector<4x286xbf16>
    %c1_143 = arith.constant 1 : index
    %c0_144 = arith.constant 0 : index
    %c0_145 = arith.constant 0 : index
    %150 = vector.load %arg2[%c1_143, %c0_144, %c0_145] : memref<9x32x4xbf16, #tpu.memory_space<vmem>>, vector<1x32x4xbf16>
    %151 = vector.shape_cast %150 : vector<1x32x4xbf16> to vector<32x4xbf16>
    %cst_146 = arith.constant dense<0.000000e+00> : vector<32x286xf32>
    %152 = tpu.matmul %151, %149, %cst_146 {dimension_numbers = #tpu.dot_dimension_numbers<[1], [0], [0], [1], [0, 0, 1, 1], [], []>} : vector<32x4xbf16>, vector<4x286xbf16>, vector<32x286xf32> -> vector<32x286xf32>
    %153 = arith.addf %147, %152 : vector<32x286xf32>
    %c1_147 = arith.constant 1 : index
    %c0_148 = arith.constant 0 : index
    %c2_149 = arith.constant 2 : index
    %154 = vector.load %arg1[%c1_147, %c0_148, %c2_149] : memref<2x8x324xbf16, #tpu.memory_space<vmem>>, vector<1x4x286xbf16>
    %155 = vector.shape_cast %154 : vector<1x4x286xbf16> to vector<4x286xbf16>
    %c2_150 = arith.constant 2 : index
    %c0_151 = arith.constant 0 : index
    %c0_152 = arith.constant 0 : index
    %156 = vector.load %arg2[%c2_150, %c0_151, %c0_152] : memref<9x32x4xbf16, #tpu.memory_space<vmem>>, vector<1x32x4xbf16>
    %157 = vector.shape_cast %156 : vector<1x32x4xbf16> to vector<32x4xbf16>
    %cst_153 = arith.constant dense<0.000000e+00> : vector<32x286xf32>
    %158 = tpu.matmul %157, %155, %cst_153 {dimension_numbers = #tpu.dot_dimension_numbers<[1], [0], [0], [1], [0, 0, 1, 1], [], []>} : vector<32x4xbf16>, vector<4x286xbf16>, vector<32x286xf32> -> vector<32x286xf32>
    %159 = arith.addf %153, %158 : vector<32x286xf32>
    %c1_154 = arith.constant 1 : index
    %c0_155 = arith.constant 0 : index
    %c18_156 = arith.constant 18 : index
    %160 = vector.load %arg1[%c1_154, %c0_155, %c18_156] : memref<2x8x324xbf16, #tpu.memory_space<vmem>>, vector<1x4x286xbf16>
    %161 = vector.shape_cast %160 : vector<1x4x286xbf16> to vector<4x286xbf16>
    %c3_157 = arith.constant 3 : index
    %c0_158 = arith.constant 0 : index
    %c0_159 = arith.constant 0 : index
    %162 = vector.load %arg2[%c3_157, %c0_158, %c0_159] : memref<9x32x4xbf16, #tpu.memory_space<vmem>>, vector<1x32x4xbf16>
    %163 = vector.shape_cast %162 : vector<1x32x4xbf16> to vector<32x4xbf16>
    %cst_160 = arith.constant dense<0.000000e+00> : vector<32x286xf32>
    %164 = tpu.matmul %163, %161, %cst_160 {dimension_numbers = #tpu.dot_dimension_numbers<[1], [0], [0], [1], [0, 0, 1, 1], [], []>} : vector<32x4xbf16>, vector<4x286xbf16>, vector<32x286xf32> -> vector<32x286xf32>
    %165 = arith.addf %159, %164 : vector<32x286xf32>
    %c1_161 = arith.constant 1 : index
    %c0_162 = arith.constant 0 : index
    %c19_163 = arith.constant 19 : index
    %166 = vector.load %arg1[%c1_161, %c0_162, %c19_163] : memref<2x8x324xbf16, #tpu.memory_space<vmem>>, vector<1x4x286xbf16>
    %167 = vector.shape_cast %166 : vector<1x4x286xbf16> to vector<4x286xbf16>
    %c4_164 = arith.constant 4 : index
    %c0_165 = arith.constant 0 : index
    %c0_166 = arith.constant 0 : index
    %168 = vector.load %arg2[%c4_164, %c0_165, %c0_166] : memref<9x32x4xbf16, #tpu.memory_space<vmem>>, vector<1x32x4xbf16>
    %169 = vector.shape_cast %168 : vector<1x32x4xbf16> to vector<32x4xbf16>
    %cst_167 = arith.constant dense<0.000000e+00> : vector<32x286xf32>
    %170 = tpu.matmul %169, %167, %cst_167 {dimension_numbers = #tpu.dot_dimension_numbers<[1], [0], [0], [1], [0, 0, 1, 1], [], []>} : vector<32x4xbf16>, vector<4x286xbf16>, vector<32x286xf32> -> vector<32x286xf32>
    %171 = arith.addf %165, %170 : vector<32x286xf32>
    %c1_168 = arith.constant 1 : index
    %c0_169 = arith.constant 0 : index
    %c20_170 = arith.constant 20 : index
    %172 = vector.load %arg1[%c1_168, %c0_169, %c20_170] : memref<2x8x324xbf16, #tpu.memory_space<vmem>>, vector<1x4x286xbf16>
    %173 = vector.shape_cast %172 : vector<1x4x286xbf16> to vector<4x286xbf16>
    %c5_171 = arith.constant 5 : index
    %c0_172 = arith.constant 0 : index
    %c0_173 = arith.constant 0 : index
    %174 = vector.load %arg2[%c5_171, %c0_172, %c0_173] : memref<9x32x4xbf16, #tpu.memory_space<vmem>>, vector<1x32x4xbf16>
    %175 = vector.shape_cast %174 : vector<1x32x4xbf16> to vector<32x4xbf16>
    %cst_174 = arith.constant dense<0.000000e+00> : vector<32x286xf32>
    %176 = tpu.matmul %175, %173, %cst_174 {dimension_numbers = #tpu.dot_dimension_numbers<[1], [0], [0], [1], [0, 0, 1, 1], [], []>} : vector<32x4xbf16>, vector<4x286xbf16>, vector<32x286xf32> -> vector<32x286xf32>
    %177 = arith.addf %171, %176 : vector<32x286xf32>
    %c1_175 = arith.constant 1 : index
    %c0_176 = arith.constant 0 : index
    %c36_177 = arith.constant 36 : index
    %178 = vector.load %arg1[%c1_175, %c0_176, %c36_177] : memref<2x8x324xbf16, #tpu.memory_space<vmem>>, vector<1x4x286xbf16>
    %179 = vector.shape_cast %178 : vector<1x4x286xbf16> to vector<4x286xbf16>
    %c6_178 = arith.constant 6 : index
    %c0_179 = arith.constant 0 : index
    %c0_180 = arith.constant 0 : index
    %180 = vector.load %arg2[%c6_178, %c0_179, %c0_180] : memref<9x32x4xbf16, #tpu.memory_space<vmem>>, vector<1x32x4xbf16>
    %181 = vector.shape_cast %180 : vector<1x32x4xbf16> to vector<32x4xbf16>
    %cst_181 = arith.constant dense<0.000000e+00> : vector<32x286xf32>
    %182 = tpu.matmul %181, %179, %cst_181 {dimension_numbers = #tpu.dot_dimension_numbers<[1], [0], [0], [1], [0, 0, 1, 1], [], []>} : vector<32x4xbf16>, vector<4x286xbf16>, vector<32x286xf32> -> vector<32x286xf32>
    %183 = arith.addf %177, %182 : vector<32x286xf32>
    %c1_182 = arith.constant 1 : index
    %c0_183 = arith.constant 0 : index
    %c37_184 = arith.constant 37 : index
    %184 = vector.load %arg1[%c1_182, %c0_183, %c37_184] : memref<2x8x324xbf16, #tpu.memory_space<vmem>>, vector<1x4x286xbf16>
    %185 = vector.shape_cast %184 : vector<1x4x286xbf16> to vector<4x286xbf16>
    %c7_185 = arith.constant 7 : index
    %c0_186 = arith.constant 0 : index
    %c0_187 = arith.constant 0 : index
    %186 = vector.load %arg2[%c7_185, %c0_186, %c0_187] : memref<9x32x4xbf16, #tpu.memory_space<vmem>>, vector<1x32x4xbf16>
    %187 = vector.shape_cast %186 : vector<1x32x4xbf16> to vector<32x4xbf16>
    %cst_188 = arith.constant dense<0.000000e+00> : vector<32x286xf32>
    %188 = tpu.matmul %187, %185, %cst_188 {dimension_numbers = #tpu.dot_dimension_numbers<[1], [0], [0], [1], [0, 0, 1, 1], [], []>} : vector<32x4xbf16>, vector<4x286xbf16>, vector<32x286xf32> -> vector<32x286xf32>
    %189 = arith.addf %183, %188 : vector<32x286xf32>
    %c1_189 = arith.constant 1 : index
    %c0_190 = arith.constant 0 : index
    %c38_191 = arith.constant 38 : index
    %190 = vector.load %arg1[%c1_189, %c0_190, %c38_191] : memref<2x8x324xbf16, #tpu.memory_space<vmem>>, vector<1x4x286xbf16>
    %191 = vector.shape_cast %190 : vector<1x4x286xbf16> to vector<4x286xbf16>
    %c8_192 = arith.constant 8 : index
    %c0_193 = arith.constant 0 : index
    %c0_194 = arith.constant 0 : index
    %192 = vector.load %arg2[%c8_192, %c0_193, %c0_194] : memref<9x32x4xbf16, #tpu.memory_space<vmem>>, vector<1x32x4xbf16>
    %193 = vector.shape_cast %192 : vector<1x32x4xbf16> to vector<32x4xbf16>
    %cst_195 = arith.constant dense<0.000000e+00> : vector<32x286xf32>
    %194 = tpu.matmul %193, %191, %cst_195 {dimension_numbers = #tpu.dot_dimension_numbers<[1], [0], [0], [1], [0, 0, 1, 1], [], []>} : vector<32x4xbf16>, vector<4x286xbf16>, vector<32x286xf32> -> vector<32x286xf32>
    %195 = arith.addf %189, %194 : vector<32x286xf32>
    %196 = vector.broadcast %0 : vector<32x1xf32> to vector<32x286xf32>
    %197 = arith.addf %195, %196 : vector<32x286xf32>
    %cst_196 = arith.constant 0.000000e+00 : f32
    %198 = vector.broadcast %cst_196 : f32 to vector<32x286xf32>
    %199 = arith.maximumf %197, %198 : vector<32x286xf32>
    %200 = vector.broadcast %2 : vector<1x286xf32> to vector<32x286xf32>
    %201 = arith.mulf %199, %200 : vector<32x286xf32>
    %cst_197 = arith.constant dense<0.000000e+00> : vector<32xf32>
    %202 = vector.multi_reduction <add>, %201, %cst_197 [1] : vector<32x286xf32> to vector<32xf32>
    %203 = vector.shape_cast %202 : vector<32xf32> to vector<32x1xf32>
    %cst_198 = arith.constant dense<0.000000e+00> : vector<16x1xf32>
    %204 = tpu.matmul %4, %203, %cst_198 {dimension_numbers = #tpu.dot_dimension_numbers<[1], [0], [0], [1], [0, 0, 1, 1], [], []>} : vector<16x32xf32>, vector<32x1xf32>, vector<16x1xf32> -> vector<16x1xf32>
    %205 = arith.addf %204, %1 : vector<16x1xf32>
    %c1_199 = arith.constant 1 : index
    %c0_200 = arith.constant 0 : index
    %c0_201 = arith.constant 0 : index
    %206 = vector.load %arg7[%c1_199, %c0_200, %c0_201] : memref<2x16x2xf32, #tpu.memory_space<vmem>>, vector<1x16x1xf32>
    %207 = vector.shape_cast %206 : vector<1x16x1xf32> to vector<16x1xf32>
    %208 = vector.shape_cast %205 : vector<16x1xf32> to vector<1x16x1xf32>
    tpu.vector_store %arg7[%c1_199, %c0_200, %c0_201], %208 {strides = array<i32>} : memref<2x16x2xf32, #tpu.memory_space<vmem>>, vector<1x16x1xf32>,
    %cst_202 = arith.constant 0.000000e+00 : f32
    %209 = vector.broadcast %cst_202 : f32 to vector<32x286xf32>
    %c1_203 = arith.constant 1 : index
    %c4_204 = arith.constant 4 : index
    %c0_205 = arith.constant 0 : index
    %210 = vector.load %arg1[%c1_203, %c4_204, %c0_205] : memref<2x8x324xbf16, #tpu.memory_space<vmem>>, vector<1x4x286xbf16>
    %211 = vector.shape_cast %210 : vector<1x4x286xbf16> to vector<4x286xbf16>
    %c0_206 = arith.constant 0 : index
    %c0_207 = arith.constant 0 : index
    %c0_208 = arith.constant 0 : index
    %212 = vector.load %arg2[%c0_206, %c0_207, %c0_208] : memref<9x32x4xbf16, #tpu.memory_space<vmem>>, vector<1x32x4xbf16>
    %213 = vector.shape_cast %212 : vector<1x32x4xbf16> to vector<32x4xbf16>
    %cst_209 = arith.constant dense<0.000000e+00> : vector<32x286xf32>
    %214 = tpu.matmul %213, %211, %cst_209 {dimension_numbers = #tpu.dot_dimension_numbers<[1], [0], [0], [1], [0, 0, 1, 1], [], []>} : vector<32x4xbf16>, vector<4x286xbf16>, vector<32x286xf32> -> vector<32x286xf32>
    %215 = arith.addf %209, %214 : vector<32x286xf32>
    %c1_210 = arith.constant 1 : index
    %c4_211 = arith.constant 4 : index
    %c1_212 = arith.constant 1 : index
    %216 = vector.load %arg1[%c1_210, %c4_211, %c1_212] : memref<2x8x324xbf16, #tpu.memory_space<vmem>>, vector<1x4x286xbf16>
    %217 = vector.shape_cast %216 : vector<1x4x286xbf16> to vector<4x286xbf16>
    %c1_213 = arith.constant 1 : index
    %c0_214 = arith.constant 0 : index
    %c0_215 = arith.constant 0 : index
    %218 = vector.load %arg2[%c1_213, %c0_214, %c0_215] : memref<9x32x4xbf16, #tpu.memory_space<vmem>>, vector<1x32x4xbf16>
    %219 = vector.shape_cast %218 : vector<1x32x4xbf16> to vector<32x4xbf16>
    %cst_216 = arith.constant dense<0.000000e+00> : vector<32x286xf32>
    %220 = tpu.matmul %219, %217, %cst_216 {dimension_numbers = #tpu.dot_dimension_numbers<[1], [0], [0], [1], [0, 0, 1, 1], [], []>} : vector<32x4xbf16>, vector<4x286xbf16>, vector<32x286xf32> -> vector<32x286xf32>
    %221 = arith.addf %215, %220 : vector<32x286xf32>
    %c1_217 = arith.constant 1 : index
    %c4_218 = arith.constant 4 : index
    %c2_219 = arith.constant 2 : index
    %222 = vector.load %arg1[%c1_217, %c4_218, %c2_219] : memref<2x8x324xbf16, #tpu.memory_space<vmem>>, vector<1x4x286xbf16>
    %223 = vector.shape_cast %222 : vector<1x4x286xbf16> to vector<4x286xbf16>
    %c2_220 = arith.constant 2 : index
    %c0_221 = arith.constant 0 : index
    %c0_222 = arith.constant 0 : index
    %224 = vector.load %arg2[%c2_220, %c0_221, %c0_222] : memref<9x32x4xbf16, #tpu.memory_space<vmem>>, vector<1x32x4xbf16>
    %225 = vector.shape_cast %224 : vector<1x32x4xbf16> to vector<32x4xbf16>
    %cst_223 = arith.constant dense<0.000000e+00> : vector<32x286xf32>
    %226 = tpu.matmul %225, %223, %cst_223 {dimension_numbers = #tpu.dot_dimension_numbers<[1], [0], [0], [1], [0, 0, 1, 1], [], []>} : vector<32x4xbf16>, vector<4x286xbf16>, vector<32x286xf32> -> vector<32x286xf32>
    %227 = arith.addf %221, %226 : vector<32x286xf32>
    %c1_224 = arith.constant 1 : index
    %c4_225 = arith.constant 4 : index
    %c18_226 = arith.constant 18 : index
    %228 = vector.load %arg1[%c1_224, %c4_225, %c18_226] : memref<2x8x324xbf16, #tpu.memory_space<vmem>>, vector<1x4x286xbf16>
    %229 = vector.shape_cast %228 : vector<1x4x286xbf16> to vector<4x286xbf16>
    %c3_227 = arith.constant 3 : index
    %c0_228 = arith.constant 0 : index
    %c0_229 = arith.constant 0 : index
    %230 = vector.load %arg2[%c3_227, %c0_228, %c0_229] : memref<9x32x4xbf16, #tpu.memory_space<vmem>>, vector<1x32x4xbf16>
    %231 = vector.shape_cast %230 : vector<1x32x4xbf16> to vector<32x4xbf16>
    %cst_230 = arith.constant dense<0.000000e+00> : vector<32x286xf32>
    %232 = tpu.matmul %231, %229, %cst_230 {dimension_numbers = #tpu.dot_dimension_numbers<[1], [0], [0], [1], [0, 0, 1, 1], [], []>} : vector<32x4xbf16>, vector<4x286xbf16>, vector<32x286xf32> -> vector<32x286xf32>
    %233 = arith.addf %227, %232 : vector<32x286xf32>
    %c1_231 = arith.constant 1 : index
    %c4_232 = arith.constant 4 : index
    %c19_233 = arith.constant 19 : index
    %234 = vector.load %arg1[%c1_231, %c4_232, %c19_233] : memref<2x8x324xbf16, #tpu.memory_space<vmem>>, vector<1x4x286xbf16>
    %235 = vector.shape_cast %234 : vector<1x4x286xbf16> to vector<4x286xbf16>
    %c4_234 = arith.constant 4 : index
    %c0_235 = arith.constant 0 : index
    %c0_236 = arith.constant 0 : index
    %236 = vector.load %arg2[%c4_234, %c0_235, %c0_236] : memref<9x32x4xbf16, #tpu.memory_space<vmem>>, vector<1x32x4xbf16>
    %237 = vector.shape_cast %236 : vector<1x32x4xbf16> to vector<32x4xbf16>
    %cst_237 = arith.constant dense<0.000000e+00> : vector<32x286xf32>
    %238 = tpu.matmul %237, %235, %cst_237 {dimension_numbers = #tpu.dot_dimension_numbers<[1], [0], [0], [1], [0, 0, 1, 1], [], []>} : vector<32x4xbf16>, vector<4x286xbf16>, vector<32x286xf32> -> vector<32x286xf32>
    %239 = arith.addf %233, %238 : vector<32x286xf32>
    %c1_238 = arith.constant 1 : index
    %c4_239 = arith.constant 4 : index
    %c20_240 = arith.constant 20 : index
    %240 = vector.load %arg1[%c1_238, %c4_239, %c20_240] : memref<2x8x324xbf16, #tpu.memory_space<vmem>>, vector<1x4x286xbf16>
    %241 = vector.shape_cast %240 : vector<1x4x286xbf16> to vector<4x286xbf16>
    %c5_241 = arith.constant 5 : index
    %c0_242 = arith.constant 0 : index
    %c0_243 = arith.constant 0 : index
    %242 = vector.load %arg2[%c5_241, %c0_242, %c0_243] : memref<9x32x4xbf16, #tpu.memory_space<vmem>>, vector<1x32x4xbf16>
    %243 = vector.shape_cast %242 : vector<1x32x4xbf16> to vector<32x4xbf16>
    %cst_244 = arith.constant dense<0.000000e+00> : vector<32x286xf32>
    %244 = tpu.matmul %243, %241, %cst_244 {dimension_numbers = #tpu.dot_dimension_numbers<[1], [0], [0], [1], [0, 0, 1, 1], [], []>} : vector<32x4xbf16>, vector<4x286xbf16>, vector<32x286xf32> -> vector<32x286xf32>
    %245 = arith.addf %239, %244 : vector<32x286xf32>
    %c1_245 = arith.constant 1 : index
    %c4_246 = arith.constant 4 : index
    %c36_247 = arith.constant 36 : index
    %246 = vector.load %arg1[%c1_245, %c4_246, %c36_247] : memref<2x8x324xbf16, #tpu.memory_space<vmem>>, vector<1x4x286xbf16>
    %247 = vector.shape_cast %246 : vector<1x4x286xbf16> to vector<4x286xbf16>
    %c6_248 = arith.constant 6 : index
    %c0_249 = arith.constant 0 : index
    %c0_250 = arith.constant 0 : index
    %248 = vector.load %arg2[%c6_248, %c0_249, %c0_250] : memref<9x32x4xbf16, #tpu.memory_space<vmem>>, vector<1x32x4xbf16>
    %249 = vector.shape_cast %248 : vector<1x32x4xbf16> to vector<32x4xbf16>
    %cst_251 = arith.constant dense<0.000000e+00> : vector<32x286xf32>
    %250 = tpu.matmul %249, %247, %cst_251 {dimension_numbers = #tpu.dot_dimension_numbers<[1], [0], [0], [1], [0, 0, 1, 1], [], []>} : vector<32x4xbf16>, vector<4x286xbf16>, vector<32x286xf32> -> vector<32x286xf32>
    %251 = arith.addf %245, %250 : vector<32x286xf32>
    %c1_252 = arith.constant 1 : index
    %c4_253 = arith.constant 4 : index
    %c37_254 = arith.constant 37 : index
    %252 = vector.load %arg1[%c1_252, %c4_253, %c37_254] : memref<2x8x324xbf16, #tpu.memory_space<vmem>>, vector<1x4x286xbf16>
    %253 = vector.shape_cast %252 : vector<1x4x286xbf16> to vector<4x286xbf16>
    %c7_255 = arith.constant 7 : index
    %c0_256 = arith.constant 0 : index
    %c0_257 = arith.constant 0 : index
    %254 = vector.load %arg2[%c7_255, %c0_256, %c0_257] : memref<9x32x4xbf16, #tpu.memory_space<vmem>>, vector<1x32x4xbf16>
    %255 = vector.shape_cast %254 : vector<1x32x4xbf16> to vector<32x4xbf16>
    %cst_258 = arith.constant dense<0.000000e+00> : vector<32x286xf32>
    %256 = tpu.matmul %255, %253, %cst_258 {dimension_numbers = #tpu.dot_dimension_numbers<[1], [0], [0], [1], [0, 0, 1, 1], [], []>} : vector<32x4xbf16>, vector<4x286xbf16>, vector<32x286xf32> -> vector<32x286xf32>
    %257 = arith.addf %251, %256 : vector<32x286xf32>
    %c1_259 = arith.constant 1 : index
    %c4_260 = arith.constant 4 : index
    %c38_261 = arith.constant 38 : index
    %258 = vector.load %arg1[%c1_259, %c4_260, %c38_261] : memref<2x8x324xbf16, #tpu.memory_space<vmem>>, vector<1x4x286xbf16>
    %259 = vector.shape_cast %258 : vector<1x4x286xbf16> to vector<4x286xbf16>
    %c8_262 = arith.constant 8 : index
    %c0_263 = arith.constant 0 : index
    %c0_264 = arith.constant 0 : index
    %260 = vector.load %arg2[%c8_262, %c0_263, %c0_264] : memref<9x32x4xbf16, #tpu.memory_space<vmem>>, vector<1x32x4xbf16>
    %261 = vector.shape_cast %260 : vector<1x32x4xbf16> to vector<32x4xbf16>
    %cst_265 = arith.constant dense<0.000000e+00> : vector<32x286xf32>
    %262 = tpu.matmul %261, %259, %cst_265 {dimension_numbers = #tpu.dot_dimension_numbers<[1], [0], [0], [1], [0, 0, 1, 1], [], []>} : vector<32x4xbf16>, vector<4x286xbf16>, vector<32x286xf32> -> vector<32x286xf32>
    %263 = arith.addf %257, %262 : vector<32x286xf32>
    %264 = vector.broadcast %0 : vector<32x1xf32> to vector<32x286xf32>
    %265 = arith.addf %263, %264 : vector<32x286xf32>
    %cst_266 = arith.constant 0.000000e+00 : f32
    %266 = vector.broadcast %cst_266 : f32 to vector<32x286xf32>
    %267 = arith.maximumf %265, %266 : vector<32x286xf32>
    %268 = vector.broadcast %2 : vector<1x286xf32> to vector<32x286xf32>
    %269 = arith.mulf %267, %268 : vector<32x286xf32>
    %cst_267 = arith.constant dense<0.000000e+00> : vector<32xf32>
    %270 = vector.multi_reduction <add>, %269, %cst_267 [1] : vector<32x286xf32> to vector<32xf32>
    %271 = vector.shape_cast %270 : vector<32xf32> to vector<32x1xf32>
    %cst_268 = arith.constant dense<0.000000e+00> : vector<16x1xf32>
    %272 = tpu.matmul %4, %271, %cst_268 {dimension_numbers = #tpu.dot_dimension_numbers<[1], [0], [0], [1], [0, 0, 1, 1], [], []>} : vector<16x32xf32>, vector<32x1xf32>, vector<16x1xf32> -> vector<16x1xf32>
    %273 = arith.addf %272, %1 : vector<16x1xf32>
    %c1_269 = arith.constant 1 : index
    %c0_270 = arith.constant 0 : index
    %c1_271 = arith.constant 1 : index
    %274 = vector.load %arg7[%c1_269, %c0_270, %c1_271] : memref<2x16x2xf32, #tpu.memory_space<vmem>>, vector<1x16x1xf32>
    %275 = vector.shape_cast %274 : vector<1x16x1xf32> to vector<16x1xf32>
    %276 = vector.shape_cast %273 : vector<16x1xf32> to vector<1x16x1xf32>
    tpu.vector_store %arg7[%c1_269, %c0_270, %c1_271], %276 {strides = array<i32>} : memref<2x16x2xf32, #tpu.memory_space<vmem>>, vector<1x16x1xf32>,
    return
  }
  func.func @transform_0(%arg0: i32) -> (i32, i32, i32) {
    %c0_i32 = arith.constant 0 : i32
    %c0_i32_0 = arith.constant 0 : i32
    %c0_i32_1 = arith.constant 0 : i32
    return %arg0, %c0_i32, %c0_i32_0 : i32, i32, i32
  }
  func.func @transform_1(%arg0: i32) -> (i32, i32, i32) {
    %c0_i32 = arith.constant 0 : i32
    %c0_i32_0 = arith.constant 0 : i32
    %c0_i32_1 = arith.constant 0 : i32
    %c0_i32_2 = arith.constant 0 : i32
    return %c0_i32, %c0_i32_0, %c0_i32_1 : i32, i32, i32
  }
  func.func @transform_2(%arg0: i32) -> (i32, i32) {
    %c0_i32 = arith.constant 0 : i32
    %c0_i32_0 = arith.constant 0 : i32
    %c0_i32_1 = arith.constant 0 : i32
    return %c0_i32, %c0_i32_0 : i32, i32
  }
  func.func @transform_3(%arg0: i32) -> (i32, i32) {
    %c0_i32 = arith.constant 0 : i32
    %c0_i32_0 = arith.constant 0 : i32
    %c0_i32_1 = arith.constant 0 : i32
    return %c0_i32, %c0_i32_0 : i32, i32
  }
  func.func @transform_4(%arg0: i32) -> (i32, i32) {
    %c0_i32 = arith.constant 0 : i32
    %c0_i32_0 = arith.constant 0 : i32
    %c0_i32_1 = arith.constant 0 : i32
    return %c0_i32, %c0_i32_0 : i32, i32
  }
  func.func @transform_5(%arg0: i32) -> (i32, i32) {
    %c0_i32 = arith.constant 0 : i32
    %c0_i32_0 = arith.constant 0 : i32
    %c0_i32_1 = arith.constant 0 : i32
    return %c0_i32, %c0_i32_0 : i32, i32
  }
  func.func @transform_6(%arg0: i32) -> (i32, i32, i32) {
    %c0_i32 = arith.constant 0 : i32
    %c0_i32_0 = arith.constant 0 : i32
    %c0_i32_1 = arith.constant 0 : i32
    return %arg0, %c0_i32, %c0_i32_0 : i32, i32, i32
  }
}

</mosaic_0001>

<bundles_post_ra>
// kernel: siamese2s_forward_pairs.1
= control target key start
LH: loop header
LB: loop body
LE: loop exit
PB: predicated region body
PF: predicated region fallthrough
CT: control target
= control target key end

     0   :  { %s7727_s21 = smov 0   ;;  %s8917_s0 = inlined_call_operand.vmem [shape: bf16[8,8,324], index: 0, kind: input, shape index: {}]   ;;  %s8918_s1 = inlined_call_operand.vmem [shape: bf16[9,32,4], index: 1, kind: input, shape index: {}]   ;;  %s8919_s2 = inlined_call_operand.vmem [shape: f32[32,1], index: 2, kind: input, shape index: {}]   ;;  %s8920_s3 = inlined_call_operand.vmem [shape: bf16[16,32], index: 3, kind: input, shape index: {}]   ;;  %s8921_s4 = inlined_call_operand.vmem [shape: f32[16,1], index: 4, kind: input, shape index: {}]   ;;  %s8922_s5 = inlined_call_operand.vmem [shape: f32[1,286], index: 5, kind: input, shape index: {}]   ;;  %s8923_s6 = inlined_call_operand.vmem [shape: f32[8,16,2], index: 6, kind: output, shape index: {}]  }
   0x1 LB: > { %s6298_s22 = sadd.s32 4294967295, %s7680_s21   ;;  %p6302_p0 = scmp.ge.s32.totalorder %s7680_s21, 1  ;;  %s7680_s21 = sphi %s7727_s21, %s16_s21  }
   0x2   : > { %p214_p1 = scmp.lt.s32.totalorder %s7680_s21, 5 }
   0x4   : > { %p215_p2 = pnand %p6302_p0, %p214_p1 }
   0x5   : > { %s6303_s23 = sshll.u32 (!%p215_p2), %s6298_s22, 1  ;;  %vm310_vm0 = vcmask (!%p215_p2), 31744   ;;  %v7738_v0 = vld [vmem:[%s8918_s1] sm:$0xff] (!%p215_p2)   ;;  %vm317_vm1 = vcmask (!%p215_p2), 1041408   ;;  %v7682_v1 = vmov (!%p215_p2), 0   ;;  %v7758_v4 = vld [vmem:[%s8918_s1 + $0x8] sm:$0xff] (!%p215_p2)  }
   0x6   : > { %218 = sbr.rel (%p215_p2) target bundleno = 2706 (0xa92), region = 44  ;;  %p247_p3 = scmp.lt.s32.totalorder (!%p215_p2), %s6303_s23, 7  ;;  %6863 = vmatprep.mubr.msk.bf16.mxu1 (!%p215_p2), %vm310_vm0, %v7738_v0  ;;  %359 = vmatprep.mubr.bf16.mxu0 (!%p215_p2), %v7682_v1  ;;  %v7768_v7 = vld [vmem:[%s8918_s1 + $0x20] sm:$0xff] (!%p215_p2)   ;;  %vm307_vm2 = vcmask (!%p215_p2), 1039360   ;;  %v7593_v17 = vld [vmem:[%s8918_s1 + $0x10] sm:$0xff] (!%p215_p2)   ;;  %v7817_v19 = vld [vmem:[%s8918_s1 + $0x28] sm:$0xff] (!%p215_p2)  }
   0x7   : > { %7587 = vset.pattern.permute.xlu1 (!%p215_p2), %v7682_v1  ;;  %7586 = vset.pattern.permute.xlu0 (!%p215_p2), %v7682_v1  ;;  %s7683_s8 = smov (!%p215_p2), 127   ;;  %s7684_s11 = smov (!%p215_p2), 126   ;;  %v7823_v21 = vld [vmem:[%s8918_s1 + $0x30] sm:$0xff] (!%p215_p2)   ;;  %v7596_v25 = vld [vmem:[%s8918_s1 + $0x18] sm:$0xff] (!%p215_p2)   ;;  %v7858_v31 = vld [vmem:[%s8918_s1 + $0x40] sm:$0xff] (!%p215_p2)   ;;  %vm577_vm3 = vcmask (!%p215_p2), 1031168  }
   0x8   : > { %s7685_s12 = smov (!%p215_p2), 110   ;;  %s7686_s13 = smov (!%p215_p2), 109   ;;  %v7851_v30 = vld [vmem:[%s8918_s1 + $0x38] sm:$0xff] (!%p215_p2)   ;;  %v262_v38 = vld [vmem:[%s8919_s2 + $0x8] sm:$0xff] (!%p215_p2)  ;;  %v261_v39 = vld [vmem:[%s8919_s2] sm:$0xff] (!%p215_p2)  ;;  %vm730_vm4 = vcmask (!%p215_p2), 900096  }
   0x9   : > { %s7687_s14 = smov (!%p215_p2), 108   ;;  %s7688_s15 = smov (!%p215_p2), 92   ;;  %v263_v43 = vld [vmem:[%s8919_s2 + $0x10] sm:$0xff] (!%p215_p2)  ;;  %v264_v44 = vld [vmem:[%s8919_s2 + $0x18] sm:$0xff] (!%p215_p2)  ;;  %v7897_v45 = vld [vmem:[%s8918_s1 + $0x48] sm:$0xff] (!%p215_p2)   ;;  %vm883_vm5 = vcmask (!%p215_p2), 891904  }
   0xa   : > { %s7689_s16 = smov (!%p215_p2), 91   ;;  %s7690_s17 = smov (!%p215_p2), 90   ;;  %v7904_v48 = vld [vmem:[%s8918_s1 + $0x50] sm:$0xff] (!%p215_p2)   ;;  %v7927_v53 = vld [vmem:[%s8918_s1 + $0x58] sm:$0xff] (!%p215_p2)   ;;  %v7932_v54 = vld [vmem:[%s8918_s1 + $0x60] sm:$0xff] (!%p215_p2)   ;;  %vm1036_vm6 = vcmask (!%p215_p2), 883712  }
   0xb   : > { %v7604_v62 = vld [vmem:[%s8918_s1 + $0x68] sm:$0xff] (!%p215_p2)   ;;  %v7605_v63 = vld [vmem:[%s8918_s1 + $0x70] sm:$0xff] (!%p215_p2)   ;;  %vm1189_vm7 = vcmask (!%p215_p2), 752640   ;;  %vm1342_vm8 = vcmask (!%p215_p2), 744448   ;;  %vm1495_vm9 = vcmask (!%p215_p2), 736256   ;;  %vm1700_vm10 = vcmask (!%p215_p2), 244736  }
   0xc   : > { %vm1720_vm11 = vcmask (!%p215_p2), 261120   ;;  %vm1802_vm12 = vcmask (!%p215_p2), 7168   ;;  %s7691_s9 = smov (!%p215_p2), 1   ;;  %vm3284_vm13 = vcmask (!%p215_p2), 15368  }
   0xd   : > { %s8925_s23 = smov (!%p247_p3, %s6303_s23), 7 }
   0xe   : > { %s7567_s26 = smul.u32 12, %s8925_s23  ;;  %s6718_s18 = sshll.u32 %s8925_s23, 4 }
   0xf   : > { %s8390_s27 = scalar_lea.vmem %s8923_s6, %s6718_s18 }
  0x10   : > { %s7748_s29 = scalar_lea.vmem %s8917_s0, %s7567_s26 }
  0x11   : > { %v7588_v2 = vld [vmem:[%s7748_s29 + $0x8] ss:$0 sps:$4 sm:$0x33]   ;;  %v272_v3 = vld [vmem:[%s7748_s29] sm:$0x33] }
  0x12   : > { %305 = vrot.lane.b32.xlu1 %v7588_v2, %s7683_s8  ;;  %v7761_v5 = vcombine.low %v272_v3, %v272_v3  ;;  %7532 = vmatprep.subr.msk.bf16.mxu1 %vm317_vm1, %v7588_v2  ;;  %v452_v6 = vsel %vm317_vm1, %v7588_v2, 0  ;;  %v6315_v8 = vcombine.high %v272_v3, %v272_v3 }
  0x13   : > { %6862 = vmatpush3.bf16.msra.mxu1 %v452_v6  ;;  %v7606_v6 = vld [vmem:[%s8918_s1 + $0x78] sm:$0xff]  }
  0x14   : > { %301 = vrot.lane.b32.xlu0 %v7761_v5, %s7683_s8  ;;  %v446_v35 = vsel %vm317_vm1, %v7761_v5, 0 }
  0x16   : > { %571 = vrot.lane.b32.xlu1 %v7761_v5, %s7684_s11  ;;  %6864 = vmatmul.mubr.msk.bf16.vlgmr.msra.gmra.mrb[0].mxu1 %vm310_vm0, %v7758_v4 }
  0x17   : > { %6869 = vmatprep.mubr.msk.bf16.mxu1 %vm310_vm0, %v7768_v7 }
  0x18   : > { %303 = vrot.lane.b32.xlu0 %v6315_v8, %s7683_s8 }
  0x1a   : > { %575 = vrot.lane.b32.xlu1 %v7588_v2, %s7684_s11 }
  0x1c   : > { %573 = vrot.lane.b32.xlu0 %v6315_v8, %s7684_s11 }
  0x1e   : > { %726 = vrot.lane.b32.xlu1 %v6315_v8, %s7685_s12 }
  0x20   : > { %724 = vrot.lane.b32.xlu0 %v7761_v5, %s7685_s12 }
  0x22   : > { %877 = vrot.lane.b32.xlu1 %v7761_v5, %s7686_s13 }
  0x24   : > { %728 = vrot.lane.b32.xlu0 %v7588_v2, %s7685_s12 }
  0x26   : > { %881 = vrot.lane.b32.xlu1 %v7588_v2, %s7686_s13 }
  0x28   : > { %879 = vrot.lane.b32.xlu0 %v6315_v8, %s7686_s13 }
  0x2a   : > { %1032 = vrot.lane.b32.xlu1 %v6315_v8, %s7687_s14 }
  0x2c   : > { %1030 = vrot.lane.b32.xlu0 %v7761_v5, %s7687_s14 }
  0x2e   : > { %1183 = vrot.lane.b32.xlu1 %v7761_v5, %s7688_s15 }
  0x30   : > { %1034 = vrot.lane.b32.xlu0 %v7588_v2, %s7687_s14 }
  0x32   : > { %1187 = vrot.lane.b32.xlu1 %v7588_v2, %s7688_s15 }
  0x34   : > { %1185 = vrot.lane.b32.xlu0 %v6315_v8, %s7688_s15 }
  0x36   : > { %1338 = vrot.lane.b32.xlu1 %v6315_v8, %s7689_s16 }
  0x38   : > { %1336 = vrot.lane.b32.xlu0 %v7761_v5, %s7689_s16 }
  0x3a   : > { %1489 = vrot.lane.b32.xlu1 %v7761_v5, %s7690_s17 }
  0x3c   : > { %1340 = vrot.lane.b32.xlu0 %v7588_v2, %s7689_s16 }
  0x3e   : > { %1493 = vrot.lane.b32.xlu1 %v7588_v2, %s7690_s17 }
  0x40   : > { %1491 = vrot.lane.b32.xlu0 %v6315_v8, %s7690_s17 }
  0x42   : > { %1634 = vperm.xlu1 %7587, %v262_v38  }
  0x44   : > { %1629 = vperm.xlu0 %7586, %v261_v39  }
  0x46   : > { %1639 = vperm.xlu1 %7587, %v263_v43  }
  0x48   : > { %1644 = vperm.xlu0 %7586, %v264_v44  }
  0x84   : > { %v306_v9 = vpop.permute.xlu1 %305 }
  0x85   : > { %v325_v22 = vsel %vm317_vm1, %v306_v9, 0 }
  0x86   : > { %v302_v10 = vpop.permute.xlu0 %301 }
  0x88   : > { %v572_v11 = vpop.permute.xlu1 %571 }
  0x8a   : > { %v304_v12 = vpop.permute.xlu0 %303 }
  0x8b   : > { %v309_v13 = vsel %vm307_vm2, %v304_v12, %v306_v9  ;;  %v308_v14 = vsel %vm307_vm2, %v302_v10, %v304_v12  ;;  %v7608_v10 = vld [vmem:[%s8918_s1 + $0x88] sm:$0xff]  }
  0x8c   : > { %6317 = vmatprep.subr.msk.bf16.mxu0 %vm317_vm1, %v309_v13  ;;  %v319_v15 = vsel %vm317_vm1, %v308_v14, 0  ;;  %v576_v16 = vpop.permute.xlu1 %575 }
  0x8d   : > { %328 = vmatpush1.bf16.msra.mxu0 %v319_v15  ;;  %7533 = vmatprep.subr.msk.bf16.mxu1 %vm317_vm1, %v576_v16  ;;  %v593_v18 = vsel %vm317_vm1, %v576_v16, 0 }
  0x8e   : > { %7531 = vmatprep.subr.msk.bf16.mxu0 %vm317_vm1, %v306_v9  ;;  %6868 = vmatpush3.bf16.msra.mxu1 %v593_v18  ;;  %v574_v20 = vpop.permute.xlu0 %573 }
  0x8f   : > { %v579_v37 = vsel %vm577_vm3, %v574_v20, %v576_v16  ;;  %v578_v41 = vsel %vm577_vm3, %v572_v11, %v574_v20 }
  0x90   : > { %6318 = vmatmul.mubr.msk.bf16.vlgmr.msra.gmra.mrb[0].mxu0 %vm310_vm0, %v7593_v17  ;;  %v7827_v23 = vpop.permute.xlu1 %726  ;;  %v587_v46 = vsel %vm317_vm1, %v578_v41, 0  ;;  %v267_v41 = vld [vmem:[%s8922_s5] sm:$0x7] }
  0x91   : > { %6856 = vmatpush3.bf16.msra.mxu0 %v325_v22  ;;  %6870 = vmatmul.mubr.msk.bf16.vlgmr.msra.gmra.mrb[0].mxu1 %vm310_vm0, %v7817_v19 }
  0x92   : > { %v7831_v24 = vpop.permute.xlu0 %724  ;;  %369 = vmatprep.mubr.bf16.mxu0 %v7682_v1  ;;  %6875 = vmatprep.mubr.msk.bf16.mxu1 %vm310_vm0, %v7823_v21 }
  0x93   : > { %6324 = vmatprep.subr.msk.bf16.mxu0 %vm317_vm1, %v6315_v8  ;;  %v731_v55 = vsel %vm730_vm4, %v7831_v24, %v7827_v23 }
  0x94   : > { %v7840_v26 = vpop.permute.xlu1 %877  ;;  %v740_v59 = vsel %vm317_vm1, %v731_v55, 0 }
  0x96   : > { %v729_v27 = vpop.permute.xlu0 %728 }
  0x97   : > { %7534 = vmatprep.subr.msk.bf16.mxu1 %vm317_vm1, %v729_v27  ;;  %v746_v28 = vsel %vm317_vm1, %v729_v27, 0  ;;  %v732_v49 = vsel %vm730_vm4, %v7827_v23, %v729_v27 }
  0x98   : > { %6319 = vmatmul.mubr.msk.bf16.gmra.mrb[4].mxu0 %vm310_vm0, %v7596_v25  ;;  %6874 = vmatpush3.bf16.msra.mxu1 %v746_v28  ;;  %v7845_v29 = vpop.permute.xlu1 %881 }
  0x99   : > { %6857 = vmatprep.mubr.msk.bf16.mxu0 %vm310_vm0, %v7593_v17  ;;  %7535 = vmatprep.subr.msk.bf16.mxu1 %vm317_vm1, %v7845_v29  ;;  %v899_v33 = vsel %vm317_vm1, %v7845_v29, 0 }
  0x9a   : > { %v7860_v32 = vpop.permute.xlu0 %879 }
  0x9b   : > { %v885_v60 = vsel %vm883_vm5, %v7860_v32, %v7845_v29  ;;  %v884_v3 = vsel %vm883_vm5, %v7840_v26, %v7860_v32 }
  0x9c   : > { %v7866_v34 = vpop.permute.xlu1 %1032 }
  0x9d   : > { %6876 = vmatmul.mubr.msk.bf16.vlgmr.msra.gmra.mrb[0].mxu1 %vm310_vm0, %v7851_v30 }
  0x9e   : > { %6880 = vmatpush3.bf16.msra.mxu1 %v899_v33  ;;  %6881 = vmatprep.mubr.msk.bf16.mxu1 %vm310_vm0, %v7858_v31  ;;  %v7872_v36 = vpop.permute.xlu0 %1030 }
  0x9f   : > { %v1037_v9 = vsel %vm1036_vm6, %v7872_v36, %v7866_v34 }
  0xa0   : > { %6858 = vmatmul.mubr.msk.bf16.vlgmr.msra.gmra.mrb[8].mxu0 %vm310_vm0, %v7596_v25  ;;  %v7886_v42 = vpop.permute.xlu1 %1183  ;;  %v1046_v11 = vsel %vm317_vm1, %v1037_v9, 0 }
  0xa1   : > { %455 = vmatpush1.bf16.msra.mxu0 %v446_v35  ;;  %486 = vmatprep.mubr.bf16.mxu0 %v7682_v1 }
  0xa2   : > { %6335 = vmatprep.subr.msk.bf16.mxu0 %vm317_vm1, %v579_v37  ;;  %v1035_v40 = vpop.permute.xlu0 %1034 }
  0xa3   : > { %7536 = vmatprep.subr.msk.bf16.mxu1 %vm317_vm1, %v1035_v40  ;;  %v1052_v47 = vsel %vm317_vm1, %v1035_v40, 0  ;;  %v1038_v5 = vsel %vm1036_vm6, %v7866_v34, %v1035_v40  ;;  %v1672_v34 = vlaneseq }
  0xa4   : > { %v1188_v51 = vpop.permute.xlu1 %1187 }
  0xa5   : > { %v1205_v56 = vsel %vm317_vm1, %v1188_v51, 0  ;;  %v1673_v35 = vshrl.u32 %v1672_v34, 7 }
  0xa6   : > { %v7910_v50 = vpop.permute.xlu0 %1185 }
  0xa7   : > { %v1191_v12 = vsel %vm1189_vm7, %v7910_v50, %v1188_v51  ;;  %v1190_v13 = vsel %vm1189_vm7, %v7886_v42, %v7910_v50  ;;  %v1674_v39 = vsub.s32 0, %v1673_v35  ;;  %v1682_v40 = vsub.s32 2, %v1673_v35 }
  0xa8   : > { %6325 = vmatmul.mubr.msk.bf16.vlgmr.msra.gmra.mrb[0].mxu0 %vm310_vm0, %v7738_v0  ;;  %v1339_v58 = vpop.permute.xlu1 %1338  ;;  %v1199_v14 = vsel %vm317_vm1, %v1190_v13, 0  ;;  %v1678_v42 = vsub.s32 1, %v1673_v35 }
  0xa9   : > { %6882 = vmatmul.mubr.msk.bf16.vlgmr.msra.gmra.mrb[0].mxu1 %vm310_vm0, %v7897_v45  ;;  %596 = vmatpush1.bf16.msra.mxu0 %v587_v46 }
  0xaa   : > { %496 = vmatprep.mubr.bf16.mxu0 %v7682_v1  ;;  %6886 = vmatpush3.bf16.msra.mxu1 %v1052_v47  ;;  %v7919_v52 = vpop.permute.xlu0 %1336  ;;  %v8045_v47 = vrot.slane %v267_v41, %v1674_v39 }
  0xab   : > { %6887 = vmatprep.mubr.msk.bf16.mxu1 %vm310_vm0, %v7904_v48  ;;  %6346 = vmatprep.subr.msk.bf16.mxu0 %vm317_vm1, %v732_v49  ;;  %v1343_v16 = vsel %vm1342_vm8, %v7919_v52, %v1339_v58  ;;  %v8047_v49 = vrot.slane %v267_v41, %v1682_v40  ;;  %v8052_v52 = vrot.slane %v267_v41, %v1678_v42  ;;  %v7609_v42 = vld [vmem:[%s7748_s29 + $0x8] ss:$0 sps:$4 sm:$0xcc]  }
  0xac   : > { %7537 = vmatprep.subr.msk.bf16.mxu1 %vm317_vm1, %v1188_v51  ;;  %v1490_v61 = vpop.permute.xlu1 %1489  ;;  %v1352_v18 = vsel %vm317_vm1, %v1343_v16, 0 }
  0xae   : > { %v1341_v57 = vpop.permute.xlu0 %1340 }
  0xaf   : > { %v1358_v0 = vsel %vm317_vm1, %v1341_v57, 0  ;;  %v1344_v15 = vsel %vm1342_vm8, %v1339_v58, %v1341_v57 }
  0xb0   : > { %6326 = vmatmul.mubr.msk.bf16.gmra.mrb[4].mxu0 %vm310_vm0, %v7758_v4  ;;  %v1494_v2 = vpop.permute.xlu1 %1493  ;;  %v893_v4 = vsel %vm317_vm1, %v884_v3, 0 }
  0xb1   : > { %627 = vmatprep.mubr.bf16.mxu0 %v7682_v1  ;;  %v1511_v8 = vsel %vm317_vm1, %v1494_v2, 0 }
  0xb2   : > { %v1492_v17 = vpop.permute.xlu0 %1491 }
  0xb3   : > { %v1496_v20 = vsel %vm1495_vm9, %v1490_v61, %v1492_v17 }
  0xb5   : > { %6888 = vmatmul.mubr.msk.bf16.vlgmr.msra.gmra.mrb[0].mxu1 %vm310_vm0, %v7927_v53 }
  0xb6   : > { %6892 = vmatpush3.bf16.msra.mxu1 %v1205_v56  ;;  %6893 = vmatprep.mubr.msk.bf16.mxu1 %vm310_vm0, %v7932_v54 }
  0xb7   : > { %7538 = vmatprep.subr.msk.bf16.mxu1 %vm317_vm1, %v1341_v57 }
  0xb8   : > { %6336 = vmatmul.mubr.msk.bf16.vlgmr.msra.gmra.mrb[0].mxu0 %vm310_vm0, %v7768_v7  ;;  %v7607_v7 = vld [vmem:[%s8918_s1 + $0x80] sm:$0xff]  }
  0xb9   : > { %749 = vmatpush1.bf16.msra.mxu0 %v740_v59  ;;  %637 = vmatprep.mubr.bf16.mxu0 %v7682_v1 }
  0xba   : > { %6357 = vmatprep.subr.msk.bf16.mxu0 %vm317_vm1, %v885_v60 }
  0xc0   : > { %6337 = vmatmul.mubr.msk.bf16.gmra.mrb[4].mxu0 %vm310_vm0, %v7817_v19  ;;  %v1497_v19 = vsel %vm1495_vm9, %v1492_v17, %v1494_v2 }
  0xc1   : > { %6894 = vmatmul.mubr.msk.bf16.vlgmr.msra.gmra.mrb[0].mxu1 %vm310_vm0, %v7604_v62  ;;  %780 = vmatprep.mubr.bf16.mxu0 %v7682_v1  ;;  %v8035_v36 = vpop.permute.xlu1 %1634 }
  0xc2   : > { %6898 = vmatpush3.bf16.msra.mxu1 %v1358_v0  ;;  %6899 = vmatprep.mubr.msk.bf16.mxu1 %vm310_vm0, %v7605_v63 }
  0xc3   : > { %7539 = vmatprep.subr.msk.bf16.mxu1 %vm317_vm1, %v1494_v2  ;;  %v8037_v37 = vpop.permute.xlu0 %1629 }
  0xc5   : > { %v8049_v50 = vpop.permute.xlu1 %1639 }
  0xc7   : > { %v8055_v58 = vpop.permute.xlu0 %1644 }
  0xc8   : > { %6347 = vmatmul.mubr.msk.bf16.vlgmr.msra.gmra.mrb[0].mxu0 %vm310_vm0, %v7823_v21  ;;  %v1505_v21 = vsel %vm317_vm1, %v1496_v20, 0 }
  0xc9   : > { %902 = vmatpush1.bf16.msra.mxu0 %v893_v4  ;;  %790 = vmatprep.mubr.bf16.mxu0 %v7682_v1 }
  0xca   : > { %6368 = vmatprep.subr.msk.bf16.mxu0 %vm317_vm1, %v1038_v5 }
  0xcd   : > { %6900 = vmatmul.mubr.msk.bf16.vlgmr.msra.gmra.mrb[0].mxu1 %vm310_vm0, %v7606_v6 }
  0xce   : > { %6904 = vmatpush3.bf16.msra.mxu1 %v1511_v8  ;;  %6905 = vmatprep.mubr.msk.bf16.mxu1 %vm310_vm0, %v7607_v7 }
  0xd0   : > { %6348 = vmatmul.mubr.msk.bf16.gmra.mrb[4].mxu0 %vm310_vm0, %v7851_v30 }
  0xd1   : > { %933 = vmatprep.mubr.bf16.mxu0 %v7682_v1 }
  0xd8   : > { %6358 = vmatmul.mubr.msk.bf16.vlgmr.msra.gmra.mrb[0].mxu0 %vm310_vm0, %v7858_v31 }
  0xd9   : > { %6906 = vmatmul.mubr.msk.bf16.vlgmr.msra.gmra.mrb[0].mxu1 %vm310_vm0, %v7608_v10  ;;  %1055 = vmatpush1.bf16.msra.mxu0 %v1046_v11 }
  0xda   : > { %943 = vmatprep.mubr.bf16.mxu0 %v7682_v1  ;;  %6379 = vmatprep.subr.msk.bf16.mxu0 %vm317_vm1, %v1191_v12 }
  0xe0   : > { %6359 = vmatmul.mubr.msk.bf16.gmra.mrb[4].mxu0 %vm310_vm0, %v7897_v45 }
  0xe1   : > { %1086 = vmatprep.mubr.bf16.mxu0 %v7682_v1 }
  0xe8   : > { %6369 = vmatmul.mubr.msk.bf16.vlgmr.msra.gmra.mrb[0].mxu0 %vm310_vm0, %v7904_v48 }
  0xe9   : > { %1208 = vmatpush1.bf16.msra.mxu0 %v1199_v14  ;;  %1096 = vmatprep.mubr.bf16.mxu0 %v7682_v1 }
  0xea   : > { %6390 = vmatprep.subr.msk.bf16.mxu0 %vm317_vm1, %v1344_v15 }
  0xf0   : > { %6370 = vmatmul.mubr.msk.bf16.gmra.mrb[4].mxu0 %vm310_vm0, %v7927_v53 }
  0xf1   : > { %1239 = vmatprep.mubr.bf16.mxu0 %v7682_v1 }
  0xf8   : > { %6380 = vmatmul.mubr.msk.bf16.vlgmr.msra.gmra.mrb[0].mxu0 %vm310_vm0, %v7932_v54 }
  0xf9   : > { %1361 = vmatpush1.bf16.msra.mxu0 %v1352_v18  ;;  %1249 = vmatprep.mubr.bf16.mxu0 %v7682_v1 }
  0xfa   : > { %6401 = vmatprep.subr.msk.bf16.mxu0 %vm317_vm1, %v1497_v19 }
 0x100   : > { %6381 = vmatmul.mubr.msk.bf16.gmra.mrb[4].mxu0 %vm310_vm0, %v7604_v62 }
 0x101   : > { %1392 = vmatprep.mubr.bf16.mxu0 %v7682_v1 }
 0x108   : > { %6391 = vmatmul.mubr.msk.bf16.vlgmr.msra.gmra.mrb[0].mxu0 %vm310_vm0, %v7605_v63 }
 0x109   : > { %1514 = vmatpush1.bf16.msra.mxu0 %v1505_v21  ;;  %1402 = vmatprep.mubr.bf16.mxu0 %v7682_v1 }
 0x110   : > { %6392 = vmatmul.mubr.msk.bf16.gmra.mrb[4].mxu0 %vm310_vm0, %v7606_v6 }
 0x111   : > { %1545 = vmatprep.mubr.bf16.mxu0 %v7682_v1 }
 0x118   : > { %6402 = vmatmul.mubr.msk.bf16.vlgmr.msra.gmra.mrb[0].mxu0 %vm310_vm0, %v7607_v7 }
 0x119   : > { %1555 = vmatprep.mubr.bf16.mxu0 %v7682_v1 }
 0x120   : > { %6403 = vmatmul.mubr.msk.bf16.gmra.mrb[4].mxu0 %vm310_vm0, %v7608_v10 }
 0x121   : > { %1891 = vmatprep.mubr.bf16.mxu0 %v7682_v1 }
 0x173   : > { %v6859_v22 = vpop.f32.mrb[8].mxu0 }
 0x174   : > { %v414_v23 = vpop.f32.mrb[9].mxu0 }
 0x175   : > { %v6860_v24 = vpop.f32.mrb[10].mxu0 }
 0x176   : > { %v417_v25 = vpop.f32.mrb[11].mxu0 }
 0x1ac   : > { %v6907_v26 = vpop.f32.mrb[0].mxu1 }
 0x1ad   : > { %v7147_v27 = vadd.f32 %v6907_v26, %v6859_v22  ;;  %v1600_v28 = vpop.f32.mrb[1].mxu1 }
 0x1ae   : > { %v7148_v29 = vadd.f32 %v1600_v28, %v414_v23  ;;  %v6908_v30 = vpop.f32.mrb[2].mxu1 }
 0x1af   : > { %v7149_v31 = vadd.f32 %v6908_v30, %v6860_v24  ;;  %v1603_v32 = vpop.f32.mrb[3].mxu1  ;;  %v1655_v0 = vadd.f32 %v7147_v27, %v8049_v50 }
 0x1b0   : > { %v7150_v33 = vadd.f32 %v1603_v32, %v417_v25  ;;  %v1649_v38 = vadd.f32 %v7148_v29, %v8037_v37 }
 0x1b1   : > { %v1658_v6 = vadd.f32 %v7149_v31, %v8055_v58  ;;  %v1667_v13 = vmax.f32 %v1655_v0, 0.0 }
 0x1b2   : > { %v1652_v43 = vadd.f32 %v7150_v33, %v8035_v36  ;;  %v1661_v45 = vmax.f32 %v1649_v38, 0.0 }
 0x1b3   : > { %v1670_v22 = vmax.f32 %v1658_v6, 0.0  ;;  %v1695_v28 = vmul.f32 %v8047_v49, %v1667_v13 }
 0x1b4   : > { %v1664_v54 = vmax.f32 %v1652_v43, 0.0  ;;  %v1689_v63 = vmul.f32 %v8047_v49, %v1661_v45  ;;  %v1805_v43 = vld [vmem:[%s7748_s29] sm:$0xcc] }
 0x1b5   : > { %v1698_v32 = vmul.f32 %v8047_v49, %v1670_v22  ;;  %v1711_v35 = vsel %vm1700_vm10, %v1695_v28, 0.0  ;;  %v6414_v45 = vcombine.low %v1805_v43, %v1805_v43 }
 0x1b6   : > { %v1692_v5 = vmul.f32 %v8047_v49, %v1664_v54  ;;  %v1701_v12 = vsel %vm1700_vm10, %v1689_v63, 0.0 }
 0x1b7   : > { %v1716_v40 = vsel %vm1700_vm10, %v1698_v32, 0.0  ;;  %v8216_v32 = vld [vmem:[%s8918_s1 + $0x30] sm:$0xff]  }
 0x1b8   : > { %v1706_v21 = vsel %vm1700_vm10, %v1692_v5, 0.0  ;;  %v7613_v5 = vld [vmem:[%s8918_s1 + $0x18] sm:$0xff]  }
 0x1eb   : > { %v1547_v44 = vpop.f32.mrb[0].mxu0 }
 0x1ec   : > { %v1647_v46 = vadd.f32 %v8037_v37, %v1547_v44  ;;  %v1549_v48 = vpop.f32.mrb[1].mxu0  ;;  %v1835_v44 = vrot.slane %v7609_v42, 2 }
 0x1ed   : > { %v1648_v51 = vadd.f32 %v8037_v37, %v1549_v48  ;;  %v1551_v53 = vpop.f32.mrb[2].mxu0  ;;  %v6415_v48 = vcombine.high %v1805_v43, %v1805_v43  ;;  %v7619_v43 = vld [vmem:[%s8918_s1 + $0x38] sm:$0xff]  }
 0x1ee   : > { %v1659_v55 = vmax.f32 %v1647_v46, 0.0  ;;  %v1650_v56 = vadd.f32 %v8035_v36, %v1551_v53  ;;  %v1553_v57 = vpop.f32.mrb[3].mxu0  ;;  %v6720_v46 = vld [vmem:[%s8920_s3] sm:$0xff]   ;;  %v8091_v53 = vrot.slane %v6414_v45, 2 }
 0x1ef   : > { %v1660_v59 = vmax.f32 %v1648_v51, 0.0  ;;  %v1651_v60 = vadd.f32 %v8035_v36, %v1553_v57  ;;  %v8086_v51 = vunpack.c.l.bf16 %v6720_v46  ;;  %v8094_v54 = vrot.slane %v6415_v48, 2 }
 0x1f0   : > { %v1687_v61 = vmul.f32 %v8045_v47, %v1659_v55  ;;  %v1662_v62 = vmax.f32 %v1650_v56, 0.0  ;;  %v8133_v63 = vunpack.c.h.bf16 %v6720_v46 }
 0x1f1   : > { %v1688_v2 = vmul.f32 %v8052_v52, %v1660_v59  ;;  %v1663_v3 = vmax.f32 %v1651_v60, 0.0  ;;  %6917 = vmatprep.mubr.msk.f32.mxu1 %vm1720_vm11, %v8086_v51 }
 0x1f2   : > { %v1690_v4 = vmul.f32 %v8045_v47, %v1662_v62 }
 0x1f3   : > { %v1691_v7 = vmul.f32 %v8052_v52, %v1663_v3  ;;  %v1557_v8 = vpop.f32.mrb[4].mxu0  ;;  %v1699_v9 = vadd.f32 %v1688_v2, %v1687_v61  ;;  %v7612_v2 = vld [vmem:[%s8918_s1 + $0x10] sm:$0xff]  }
 0x1f4   : > { %v1653_v10 = vadd.f32 %v8049_v50, %v1557_v8  ;;  %v1559_v11 = vpop.f32.mrb[5].mxu0  ;;  %v1984_v8 = vsel %vm317_vm1, %v1835_v44, 0 }
 0x1f5   : > { %v1654_v14 = vadd.f32 %v8049_v50, %v1559_v11  ;;  %v1561_v15 = vpop.f32.mrb[6].mxu0  ;;  %v1702_v16 = vadd.f32 %v1701_v12, %v1699_v9  ;;  %v1705_v17 = vadd.f32 %v1691_v7, %v1690_v4  ;;  %v8151_v7 = vld [vmem:[%s8918_s1] sm:$0xff]  }
 0x1f6   : > { %v1665_v18 = vmax.f32 %v1653_v10, 0.0  ;;  %v1656_v19 = vadd.f32 %v8055_v58, %v1561_v15  ;;  %v1563_v20 = vpop.f32.mrb[7].mxu0 }
 0x1f7   : > { %v1666_v23 = vmax.f32 %v1654_v14, 0.0  ;;  %v1657_v24 = vadd.f32 %v8055_v58, %v1563_v20  ;;  %1703 = vadd.xlane.f32.xlu1 %v1702_v16  ;;  %v1707_v25 = vadd.f32 %v1706_v21, %v1705_v17  ;;  %v8168_v14 = vld [vmem:[%s8918_s1 + $0x8] sm:$0xff]   ;;  %v8175_v16 = vld [vmem:[%s8918_s1 + $0x20] sm:$0xff]  }
 0x1f8   : > { %v1693_v26 = vmul.f32 %v8045_v47, %v1665_v18  ;;  %v1668_v27 = vmax.f32 %v1656_v19, 0.0 }
 0x1f9   : > { %v1694_v29 = vmul.f32 %v8052_v52, %v1666_v23  ;;  %v1669_v30 = vmax.f32 %v1657_v24, 0.0  ;;  %1708 = vadd.xlane.f32.xlu0 %v1707_v25 }
 0x1fa   : > { %v1696_v31 = vmul.f32 %v8045_v47, %v1668_v27  ;;  %v8201_v27 = vld [vmem:[%s8918_s1 + $0x28] sm:$0xff]  }
 0x1fb   : > { %v1697_v33 = vmul.f32 %v8052_v52, %v1669_v30  ;;  %v1710_v34 = vadd.f32 %v1694_v29, %v1693_v26  ;;  %v1978_v30 = vsel %vm317_vm1, %v8091_v53, 0 }
 0x1fd   : > { %v1712_v38 = vadd.f32 %v1711_v35, %v1710_v34  ;;  %v1715_v39 = vadd.f32 %v1697_v33, %v1696_v31 }
 0x1ff   : > { %1713 = vadd.xlane.f32.xlu0 %v1712_v38  ;;  %v1717_v41 = vadd.f32 %v1716_v40, %v1715_v39 }
 0x201   : > { %1718 = vadd.xlane.f32.xlu1 %v1717_v41 }
 0x212   : > { %2106 = vrot.lane.b32.xlu1 %v1835_v44, %s7684_s11 }
 0x215   : > { %1840 = vrot.lane.b32.xlu0 %v1835_v44, %s7683_s8 }
 0x216   : > { %2257 = vrot.lane.b32.xlu1 %v1835_v44, %s7685_s12 }
 0x219   : > { %2404 = vrot.lane.b32.xlu0 %v8091_v53, %s7686_s13 }
 0x21a   : > { %2406 = vrot.lane.b32.xlu1 %v8094_v54, %s7686_s13 }
 0x21d   : > { %2408 = vrot.lane.b32.xlu0 %v1835_v44, %s7686_s13 }
 0x21e   : > { %2555 = vrot.lane.b32.xlu1 %v8091_v53, %s7687_s14 }
 0x221   : > { %2557 = vrot.lane.b32.xlu0 %v8094_v54, %s7687_s14 }
 0x222   : > { %2559 = vrot.lane.b32.xlu1 %v1835_v44, %s7687_s14 }
 0x225   : > { %2706 = vrot.lane.b32.xlu0 %v8091_v53, %s7688_s15 }
 0x226   : > { %2708 = vrot.lane.b32.xlu1 %v8094_v54, %s7688_s15 }
 0x229   : > { %2710 = vrot.lane.b32.xlu0 %v1835_v44, %s7688_s15 }
 0x22a   : > { %1836 = vrot.lane.b32.xlu1 %v8091_v53, %s7683_s8 }
 0x22d   : > { %1838 = vrot.lane.b32.xlu0 %v8094_v54, %s7683_s8 }
 0x22e   : > { %2857 = vrot.lane.b32.xlu1 %v8091_v53, %s7689_s16 }
 0x231   : > { %2859 = vrot.lane.b32.xlu0 %v8094_v54, %s7689_s16 }
 0x232   : > { %2861 = vrot.lane.b32.xlu1 %v1835_v44, %s7689_s16 }
 0x235   : > { %2102 = vrot.lane.b32.xlu0 %v8091_v53, %s7684_s11 }
 0x236   : > { %2104 = vrot.lane.b32.xlu1 %v8094_v54, %s7684_s11 }
 0x239   : > { %3008 = vrot.lane.b32.xlu0 %v8091_v53, %s7690_s17 }
 0x23a   : > { %3010 = vrot.lane.b32.xlu1 %v8094_v54, %s7690_s17 }
 0x23d   : > { %3012 = vrot.lane.b32.xlu0 %v1835_v44, %s7690_s17 }
 0x23e   : > { %2253 = vrot.lane.b32.xlu1 %v8091_v53, %s7685_s12 }
 0x241   : > { %2255 = vrot.lane.b32.xlu0 %v8094_v54, %s7685_s12 }
 0x284   : > { %v1704_v55 = vpop.xlane.xlu1 %1703 }
 0x286   : > { %v1709_v56 = vpop.xlane.xlu0 %1708 }
 0x287   : > { %v7115_v57 = vpack.c.bf16 %v1709_v56, %v1704_v55  ;;  %v7620_v56 = vld [vmem:[%s8918_s1 + $0x40] sm:$0xff]  }
 0x289   : > { %7116 = vmatprep.subr.bf16.mxu1 %v7115_v57 }
 0x28a   : > { %7118 = vmatpush3.bf16.msra.mxu1 %v7115_v57 }
 0x28c   : > { %v1714_v59 = vpop.xlane.xlu0 %1713 }
 0x28e   : > { %v1719_v60 = vpop.xlane.xlu1 %1718 }
 0x28f   : > { %v7119_v61 = vpack.c.bf16 %v1719_v60, %v1714_v59 }
 0x290   : > { %v1841_v62 = vpop.permute.xlu0 %1840 }
 0x291   : > { %7120 = vmatprep.subr.bf16.mxu1 %v7119_v61  ;;  %v1857_v3 = vsel %vm317_vm1, %v1841_v62, 0 }
 0x292   : > { %7122 = vmatpush3.bf16.msra.mxu1 %v7119_v61  ;;  %v2107_v0 = vpop.permute.xlu1 %2106  ;;  %v7621_v61 = vld [vmem:[%s8918_s1 + $0x48] sm:$0xff]  }
 0x293   : > { %7540 = vmatprep.subr.msk.bf16.mxu1 %vm317_vm1, %v1841_v62  ;;  %v2123_v17 = vsel %vm317_vm1, %v2107_v0, 0 }
 0x294   : > { %v2405_v4 = vpop.permute.xlu0 %2404 }
 0x295   : > { %6918 = vmatmul.mubr.msk.f32.vlgmr.msra.gmra.mrb[4].mxu1 %vm1720_vm11, %v8133_v63 }
 0x296   : > { %6921 = vmatpush3.bf16.msra.mxu1 %v1857_v3  ;;  %v8145_v6 = vpop.permute.xlu1 %2257  ;;  %6922 = vmatprep.mubr.msk.bf16.mxu1 %vm310_vm0, %v7612_v2 }
 0x297   : > { %7541 = vmatprep.subr.msk.bf16.mxu1 %vm317_vm1, %v1835_v44  ;;  %v2274_v31 = vsel %vm317_vm1, %v8145_v6, 0 }
 0x298   : > { %v8155_v9 = vpop.permute.xlu0 %2408 }
 0x299   : > { %6923 = vmatmul.mubr.msk.bf16.vlgmr.msra.gmra.mrb[8].mxu1 %vm310_vm0, %v7613_v5  ;;  %v2425_v59 = vsel %vm317_vm1, %v8155_v9, 0 }
 0x29a   : > { %v2407_v10 = vpop.permute.xlu1 %2406  ;;  %6927 = vmatpush3.bf16.msra.mxu1 %v1984_v8  ;;  %6928 = vmatprep.mubr.msk.bf16.mxu1 %vm310_vm0, %v8151_v7 }
 0x29b   : > { %7542 = vmatprep.subr.msk.bf16.mxu1 %vm317_vm1, %v2107_v0  ;;  %v2411_v33 = vsel %vm883_vm5, %v2407_v10, %v8155_v9  ;;  %v2410_v41 = vsel %vm883_vm5, %v2405_v4, %v2407_v10  ;;  %v7622_v4 = vld [vmem:[%s8918_s1 + $0x50] sm:$0xff]  }
 0x29c   : > { %v8161_v11 = vpop.permute.xlu0 %2557  ;;  %v2419_v45 = vsel %vm317_vm1, %v2410_v41, 0 }
 0x29e   : > { %v8163_v12 = vpop.permute.xlu1 %2555 }
 0x2a0   : > { %v2707_v13 = vpop.permute.xlu0 %2706 }
 0x2a2   : > { %v8170_v15 = vpop.permute.xlu1 %2559 }
 0x2a3   : > { %v2562_v57 = vsel %vm1036_vm6, %v8161_v11, %v8170_v15 }
 0x2a4   : > { %v8178_v18 = vpop.permute.xlu0 %2710 }
 0x2a5   : > { %6929 = vmatmul.mubr.msk.bf16.vlgmr.msra.gmra.mrb[8].mxu1 %vm310_vm0, %v8168_v14 }
 0x2a6   : > { %v8182_v19 = vpop.permute.xlu1 %2708  ;;  %6933 = vmatpush3.bf16.msra.mxu1 %v2123_v17  ;;  %6934 = vmatprep.mubr.msk.bf16.mxu1 %vm310_vm0, %v8175_v16  ;;  %v7627_v17 = vld [vmem:[%s8918_s1 + $0x78] sm:$0xff]  }
 0x2a7   : > { %v8188_v20 = vsel %vm1189_vm7, %v2707_v13, %v8182_v19  ;;  %7543 = vmatprep.subr.msk.bf16.mxu1 %vm317_vm1, %v8145_v6 }
 0x2a8   : > { %v1839_v21 = vpop.permute.xlu0 %1838  ;;  %v2721_v8 = vsel %vm317_vm1, %v8188_v20, 0 }
 0x2a9   : > { %v1843_v22 = vsel %vm307_vm2, %v1839_v21, %v1841_v62 }
 0x2aa   : > { %6417 = vmatprep.subr.msk.bf16.mxu0 %vm317_vm1, %v1843_v22  ;;  %v1837_v23 = vpop.permute.xlu1 %1836  ;;  %v266_v22 = vld [vmem:[%s8921_s4 + $0x8] sm:$0xff] }
 0x2ab   : > { %v1842_v24 = vsel %vm307_vm2, %v1837_v23, %v1839_v21  ;;  %v7629_v21 = vld [vmem:[%s8918_s1 + $0x88] sm:$0xff]   ;;  %v265_v23 = vld [vmem:[%s8921_s4] sm:$0xff] }
 0x2ac   : > { %v1851_v25 = vsel %vm317_vm1, %v1842_v24, 0  ;;  %v8196_v26 = vpop.permute.xlu0 %2859 }
 0x2ad   : > { %1860 = vmatpush1.bf16.msra.mxu0 %v1851_v25 }
 0x2ae   : > { %v2858_v28 = vpop.permute.xlu1 %2857  ;;  %6424 = vmatprep.subr.msk.bf16.mxu0 %vm317_vm1, %v8094_v54 }
 0x2af   : > { %v8207_v29 = vsel %vm1342_vm8, %v2858_v28, %v8196_v26 }
 0x2b0   : > { %v2103_v34 = vpop.permute.xlu0 %2102  ;;  %6418 = vmatmul.mubr.msk.bf16.vlgmr.msra.gmra.mrb[12].mxu0 %vm310_vm0, %v7612_v2  ;;  %v2561_v2 = vsel %vm1036_vm6, %v8163_v12, %v8161_v11  ;;  %v2727_v11 = vsel %vm317_vm1, %v8178_v18, 0  ;;  %v7625_v12 = vld [vmem:[%s8918_s1 + $0x68] sm:$0xff]   ;;  %v2872_v13 = vsel %vm317_vm1, %v8207_v29, 0 }
 0x2b1   : > { %6935 = vmatmul.mubr.msk.bf16.vlgmr.msra.gmra.mrb[8].mxu1 %vm310_vm0, %v8201_v27  ;;  %1901 = vmatprep.mubr.bf16.mxu0 %v7682_v1  ;;  %v2570_v3 = vsel %vm317_vm1, %v2561_v2, 0 }
 0x2b2   : > { %v8224_v35 = vpop.permute.xlu1 %2861  ;;  %1987 = vmatpush1.bf16.msra.mxu0 %v1978_v30  ;;  %6939 = vmatpush3.bf16.msra.mxu1 %v2274_v31 }
 0x2b3   : > { %6940 = vmatprep.mubr.msk.bf16.mxu1 %vm310_vm0, %v8216_v32  ;;  %6457 = vmatprep.subr.msk.bf16.mxu1 %vm317_vm1, %v2411_v33  ;;  %v2864_v10 = vsel %vm1342_vm8, %v8196_v26, %v8224_v35 }
 0x2b4   : > { %v3009_v38 = vpop.permute.xlu0 %3008 }
 0x2b6   : > { %v2105_v39 = vpop.permute.xlu1 %2104 }
 0x2b7   : > { %v2109_v40 = vsel %vm577_vm3, %v2105_v39, %v2107_v0  ;;  %v2108_v46 = vsel %vm577_vm3, %v2103_v34, %v2105_v39 }
 0x2b8   : > { %v8231_v42 = vpop.permute.xlu0 %3012  ;;  %6419 = vmatmul.mubr.msk.bf16.gmra.mrb[16].mxu0 %vm310_vm0, %v7613_v5  ;;  %6435 = vmatprep.subr.msk.bf16.mxu0 %vm317_vm1, %v2109_v40  ;;  %v2117_v53 = vsel %vm317_vm1, %v2108_v46, 0  ;;  %v2713_v5 = vsel %vm1189_vm7, %v8182_v19, %v8178_v18  ;;  %v7628_v19 = vld [vmem:[%s8918_s1 + $0x80] sm:$0xff]  }
 0x2b9   : > { %2018 = vmatprep.mubr.bf16.mxu0 %v7682_v1  ;;  %v3029_v20 = vsel %vm317_vm1, %v8231_v42, 0 }
 0x2ba   : > { %v8239_v44 = vpop.permute.xlu1 %3010 }
 0x2bb   : > { %v8245_v48 = vsel %vm1495_vm9, %v3009_v38, %v8239_v44 }
 0x2bc   : > { %v2256_v54 = vpop.permute.xlu0 %2255 }
 0x2bd   : > { %6941 = vmatmul.mubr.msk.bf16.vlgmr.msra.gmra.mrb[8].mxu1 %vm310_vm0, %v7619_v43  ;;  %v2260_v55 = vsel %vm730_vm4, %v2256_v54, %v8145_v6  ;;  %v2576_v6 = vsel %vm317_vm1, %v8170_v15, 0 }
 0x2be   : > { %2428 = vmatpush1.bf16.msra.mxu1 %v2419_v45  ;;  %2459 = vmatprep.mubr.bf16.mxu1 %v7682_v1  ;;  %v2254_v60 = vpop.permute.xlu1 %2253 }
 0x2bf   : > { %7544 = vmatprep.subr.msk.bf16.mxu1 %vm317_vm1, %v8155_v9  ;;  %v2259_v62 = vsel %vm730_vm4, %v2254_v60, %v2256_v54  ;;  %v7624_v9 = vld [vmem:[%s8918_s1 + $0x60] sm:$0xff]  }
 0x2c0   : > { %6425 = vmatmul.mubr.msk.bf16.vlgmr.msra.gmra.mrb[12].mxu0 %vm310_vm0, %v8151_v7  ;;  %v2268_v0 = vsel %vm317_vm1, %v2259_v62, 0  ;;  %v7623_v7 = vld [vmem:[%s8918_s1 + $0x58] sm:$0xff]  }
 0x2c1   : > { %2126 = vmatpush1.bf16.msra.mxu0 %v2117_v53  ;;  %2028 = vmatprep.mubr.bf16.mxu0 %v7682_v1 }
 0x2c2   : > { %6446 = vmatprep.subr.msk.bf16.mxu0 %vm317_vm1, %v2260_v55 }
 0x2c5   : > { %6458 = vmatmul.mubr.msk.bf16.vlgmr.msra.gmra.mrb[12].mxu1 %vm310_vm0, %v7620_v56 }
 0x2c6   : > { %6945 = vmatpush3.bf16.msra.mxu1 %v2425_v59  ;;  %2469 = vmatprep.mubr.bf16.mxu1 %v7682_v1 }
 0x2c7   : > { %6468 = vmatprep.subr.msk.bf16.mxu1 %vm317_vm1, %v2562_v57 }
 0x2c8   : > { %6426 = vmatmul.mubr.msk.bf16.gmra.mrb[16].mxu0 %vm310_vm0, %v8168_v14  ;;  %v7626_v14 = vld [vmem:[%s8918_s1 + $0x70] sm:$0xff]  }
 0x2c9   : > { %2157 = vmatprep.mubr.bf16.mxu0 %v7682_v1 }
 0x2cd   : > { %6459 = vmatmul.mubr.msk.bf16.gmra.mrb[16].mxu1 %vm310_vm0, %v7621_v61 }
 0x2ce   : > { %6946 = vmatprep.mubr.msk.bf16.mxu1 %vm310_vm0, %v7620_v56 }
 0x2d0   : > { %6436 = vmatmul.mubr.msk.bf16.vlgmr.msra.gmra.mrb[12].mxu0 %vm310_vm0, %v8175_v16  ;;  %v2878_v16 = vsel %vm317_vm1, %v8224_v35, 0 }
 0x2d1   : > { %2167 = vmatprep.mubr.bf16.mxu0 %v7682_v1  ;;  %2277 = vmatpush1.bf16.msra.mxu0 %v2268_v0 }
 0x2d5   : > { %6947 = vmatmul.mubr.msk.bf16.vlgmr.msra.gmra.mrb[8].mxu1 %vm310_vm0, %v7621_v61 }
 0x2d6   : > { %2579 = vmatpush1.bf16.msra.mxu1 %v2570_v3  ;;  %2610 = vmatprep.mubr.bf16.mxu1 %v7682_v1 }
 0x2d7   : > { %7545 = vmatprep.subr.msk.bf16.mxu1 %vm317_vm1, %v8170_v15  ;;  %v3015_v15 = vsel %vm1495_vm9, %v8239_v44, %v8231_v42 }
 0x2d8   : > { %6437 = vmatmul.mubr.msk.bf16.gmra.mrb[16].mxu0 %vm310_vm0, %v8201_v27 }
 0x2d9   : > { %2308 = vmatprep.mubr.bf16.mxu0 %v7682_v1 }
 0x2dd   : > { %6469 = vmatmul.mubr.msk.bf16.vlgmr.msra.gmra.mrb[12].mxu1 %vm310_vm0, %v7622_v4 }
 0x2de   : > { %6951 = vmatpush3.bf16.msra.mxu1 %v2576_v6  ;;  %2620 = vmatprep.mubr.bf16.mxu1 %v7682_v1 }
 0x2df   : > { %6479 = vmatprep.subr.msk.bf16.mxu1 %vm317_vm1, %v2713_v5 }
 0x2e0   : > { %6447 = vmatmul.mubr.msk.bf16.vlgmr.msra.gmra.mrb[12].mxu0 %vm310_vm0, %v8216_v32 }
 0x2e1   : > { %2318 = vmatprep.mubr.bf16.mxu0 %v7682_v1 }
 0x2e5   : > { %6470 = vmatmul.mubr.msk.bf16.gmra.mrb[16].mxu1 %vm310_vm0, %v7623_v7 }
 0x2e6   : > { %6952 = vmatprep.mubr.msk.bf16.mxu1 %vm310_vm0, %v7622_v4 }
 0x2e8   : > { %6448 = vmatmul.mubr.msk.bf16.gmra.mrb[16].mxu0 %vm310_vm0, %v7619_v43 }
 0x2e9   : > { %6982 = vmatprep.mubr.msk.f32.mxu0 %vm1720_vm11, %v8086_v51 }
 0x2ed   : > { %6953 = vmatmul.mubr.msk.bf16.vlgmr.msra.gmra.mrb[8].mxu1 %vm310_vm0, %v7623_v7 }
 0x2ee   : > { %2730 = vmatpush1.bf16.msra.mxu1 %v2721_v8  ;;  %2761 = vmatprep.mubr.bf16.mxu1 %v7682_v1 }
 0x2ef   : > { %7546 = vmatprep.subr.msk.bf16.mxu1 %vm317_vm1, %v8178_v18  ;;  %v3023_v18 = vsel %vm317_vm1, %v8245_v48, 0 }
 0x2f5   : > { %6480 = vmatmul.mubr.msk.bf16.vlgmr.msra.gmra.mrb[12].mxu1 %vm310_vm0, %v7624_v9 }
 0x2f6   : > { %6957 = vmatpush3.bf16.msra.mxu1 %v2727_v11  ;;  %2771 = vmatprep.mubr.bf16.mxu1 %v7682_v1 }
 0x2f7   : > { %6490 = vmatprep.subr.msk.bf16.mxu1 %vm317_vm1, %v2864_v10 }
 0x2fd   : > { %6481 = vmatmul.mubr.msk.bf16.gmra.mrb[16].mxu1 %vm310_vm0, %v7625_v12 }
 0x2fe   : > { %6958 = vmatprep.mubr.msk.bf16.mxu1 %vm310_vm0, %v7624_v9 }
 0x305   : > { %6959 = vmatmul.mubr.msk.bf16.vlgmr.msra.gmra.mrb[8].mxu1 %vm310_vm0, %v7625_v12 }
 0x306   : > { %2881 = vmatpush1.bf16.msra.mxu1 %v2872_v13  ;;  %2912 = vmatprep.mubr.bf16.mxu1 %v7682_v1 }
 0x307   : > { %7547 = vmatprep.subr.msk.bf16.mxu1 %vm317_vm1, %v8224_v35 }
 0x30d   : > { %6491 = vmatmul.mubr.msk.bf16.vlgmr.msra.gmra.mrb[12].mxu1 %vm310_vm0, %v7626_v14 }
 0x30e   : > { %6963 = vmatpush3.bf16.msra.mxu1 %v2878_v16  ;;  %2922 = vmatprep.mubr.bf16.mxu1 %v7682_v1 }
 0x30f   : > { %6501 = vmatprep.subr.msk.bf16.mxu1 %vm317_vm1, %v3015_v15 }
 0x315   : > { %6492 = vmatmul.mubr.msk.bf16.gmra.mrb[16].mxu1 %vm310_vm0, %v7627_v17 }
 0x316   : > { %6964 = vmatprep.mubr.msk.bf16.mxu1 %vm310_vm0, %v7626_v14 }
 0x31d   : > { %6965 = vmatmul.mubr.msk.bf16.vlgmr.msra.gmra.mrb[8].mxu1 %vm310_vm0, %v7627_v17 }
 0x31e   : > { %3032 = vmatpush1.bf16.msra.mxu1 %v3023_v18  ;;  %3063 = vmatprep.mubr.bf16.mxu1 %v7682_v1 }
 0x31f   : > { %7548 = vmatprep.subr.msk.bf16.mxu1 %vm317_vm1, %v8231_v42 }
 0x325   : > { %6502 = vmatmul.mubr.msk.bf16.vlgmr.msra.gmra.mrb[12].mxu1 %vm310_vm0, %v7628_v19 }
 0x326   : > { %6969 = vmatpush3.bf16.msra.mxu1 %v3029_v20  ;;  %3073 = vmatprep.mubr.bf16.mxu1 %v7682_v1 }
 0x32d   : > { %6503 = vmatmul.mubr.msk.bf16.gmra.mrb[16].mxu1 %vm310_vm0, %v7629_v21 }
 0x32e   : > { %6970 = vmatprep.mubr.msk.bf16.mxu1 %vm310_vm0, %v7628_v19 }
 0x335   : > { %6971 = vmatmul.mubr.msk.bf16.vlgmr.msra.gmra.mrb[8].mxu1 %vm310_vm0, %v7629_v21 }
 0x336   : > { %7047 = vmatprep.mubr.msk.f32.mxu1 %vm1720_vm11, %v8086_v51 }
 0x368   : > { %v6919_v24 = vpop.f32.mrb[4].mxu1 }
 0x369   : > { %v1799_v25 = vadd.f32 %v6919_v24, %v266_v22  ;;  %v1793_v26 = vpop.f32.mrb[5].mxu1 }
 0x36a   : > { %v1794_v27 = vadd.f32 %v1793_v26, %v265_v23 }
 0x36b   : > { %1804 = vst.msk [vmem:[%s8390_s27 + $0x8] sm:$0xff] %vm1802_vm12, %v1799_v25 }
 0x36c   : > { %1803 = vst.msk [vmem:[%s8390_s27] sm:$0xff] %vm1802_vm12, %v1794_v27 }
 0x3b3   : > { %v2310_v28 = vpop.f32.mrb[12].mxu0 }
 0x3b4   : > { %v2312_v29 = vpop.f32.mrb[13].mxu0 }
 0x3b5   : > { %v2314_v30 = vpop.f32.mrb[14].mxu0 }
 0x3b6   : > { %v2316_v31 = vpop.f32.mrb[15].mxu0 }
 0x3bb   : > { %v2320_v32 = vpop.f32.mrb[16].mxu0 }
 0x3bc   : > { %v2322_v33 = vpop.f32.mrb[17].mxu0 }
 0x3bd   : > { %v2324_v34 = vpop.f32.mrb[18].mxu0 }
 0x3be   : > { %v2326_v35 = vpop.f32.mrb[19].mxu0 }
 0x3f8   : > { %v3065_v38 = vpop.f32.mrb[12].mxu1 }
 0x3f9   : > { %v7151_v39 = vadd.f32 %v3065_v38, %v2310_v28  ;;  %v3067_v40 = vpop.f32.mrb[13].mxu1 }
 0x3fa   : > { %v7152_v41 = vadd.f32 %v3067_v40, %v2312_v29  ;;  %v3069_v42 = vpop.f32.mrb[14].mxu1 }
 0x3fb   : > { %v3145_v43 = vadd.f32 %v7151_v39, %v8037_v37  ;;  %v7153_v44 = vadd.f32 %v3069_v42, %v2314_v30  ;;  %v3071_v45 = vpop.f32.mrb[15].mxu1 }
 0x3fc   : > { %v3146_v46 = vadd.f32 %v7152_v41, %v8037_v37  ;;  %v7154_v48 = vadd.f32 %v3071_v45, %v2316_v31 }
 0x3fd   : > { %v3157_v53 = vmax.f32 %v3145_v43, 0.0  ;;  %v3148_v54 = vadd.f32 %v7153_v44, %v8035_v36 }
 0x3fe   : > { %v3158_v55 = vmax.f32 %v3146_v46, 0.0  ;;  %v3149_v56 = vadd.f32 %v7154_v48, %v8035_v36 }
 0x3ff   : > { %v3169_v57 = vmul.f32 %v3157_v53, %v8045_v47  ;;  %v3160_v59 = vmax.f32 %v3148_v54, 0.0 }
 0x400   : > { %v3170_v60 = vmul.f32 %v3158_v55, %v8052_v52  ;;  %v3161_v61 = vmax.f32 %v3149_v56, 0.0  ;;  %v3075_v62 = vpop.f32.mrb[16].mxu1 }
 0x401   : > { %v3172_v0 = vmul.f32 %v3160_v59, %v8045_v47  ;;  %v7155_v2 = vadd.f32 %v3075_v62, %v2320_v32  ;;  %v3077_v3 = vpop.f32.mrb[17].mxu1 }
 0x402   : > { %v3173_v4 = vmul.f32 %v3161_v61, %v8052_v52  ;;  %v7156_v5 = vadd.f32 %v3077_v3, %v2322_v33  ;;  %v3079_v6 = vpop.f32.mrb[18].mxu1  ;;  %v3181_v7 = vadd.f32 %v3170_v60, %v3169_v57  ;;  %v6508_v57 = vld [vmem:[%s7748_s29 + $0xc] sm:$0x33]  ;;  %v8427_v61 = vld [vmem:[%s7748_s29 + $0x14] ss:$0 sps:$4 sm:$0x33]  }
 0x403   : > { %v3151_v8 = vadd.f32 %v7155_v2, %v8049_v50  ;;  %v7157_v9 = vadd.f32 %v3079_v6, %v2324_v34  ;;  %v3081_v10 = vpop.f32.mrb[19].mxu1  ;;  %v6517_v59 = vcombine.high %v6508_v57, %v6508_v57  ;;  %v6516_v60 = vcombine.low %v6508_v57, %v6508_v57 }
 0x404   : > { %v3152_v11 = vadd.f32 %v7156_v5, %v8049_v50  ;;  %v7158_v12 = vadd.f32 %v3081_v10, %v2326_v35  ;;  %v3186_v13 = vadd.f32 %v3173_v4, %v3172_v0 }
 0x405   : > { %v3163_v14 = vmax.f32 %v3151_v8, 0.0  ;;  %v3154_v15 = vadd.f32 %v7157_v9, %v8055_v58 }
 0x406   : > { %v3164_v16 = vmax.f32 %v3152_v11, 0.0  ;;  %v3155_v17 = vadd.f32 %v7158_v12, %v8055_v58  ;;  %v7633_v12 = vld [vmem:[%s8918_s1 + $0x10] sm:$0xff]  }
 0x407   : > { %v3175_v18 = vmul.f32 %v3163_v14, %v8045_v47  ;;  %v3166_v19 = vmax.f32 %v3154_v15, 0.0  ;;  %v7634_v14 = vld [vmem:[%s8918_s1 + $0x18] sm:$0xff]   ;;  %v3458_v15 = vsel %vm317_vm1, %v6516_v60, 0 }
 0x408   : > { %v3176_v20 = vmul.f32 %v3164_v16, %v8052_v52  ;;  %v3167_v21 = vmax.f32 %v3155_v17, 0.0  ;;  %v6972_v22 = vpop.f32.mrb[8].mxu1  ;;  %v7635_v17 = vld [vmem:[%s8918_s1] sm:$0xff]  }
 0x409   : > { %v3178_v23 = vmul.f32 %v3166_v19, %v8045_v47  ;;  %v3153_v24 = vadd.f32 %v6972_v22, %v8049_v50  ;;  %v3118_v25 = vpop.f32.mrb[9].mxu1  ;;  %v7636_v22 = vld [vmem:[%s8918_s1 + $0x8] sm:$0xff]  }
 0x40a   : > { %v3179_v26 = vmul.f32 %v3167_v21, %v8052_v52  ;;  %v3147_v27 = vadd.f32 %v3118_v25, %v8037_v37  ;;  %v6973_v28 = vpop.f32.mrb[10].mxu1  ;;  %v3191_v29 = vadd.f32 %v3176_v20, %v3175_v18  ;;  %v3464_v20 = vsel %vm317_vm1, %v8427_v61, 0 }
 0x40b   : > { %v3165_v30 = vmax.f32 %v3153_v24, 0.0  ;;  %v3156_v31 = vadd.f32 %v6973_v28, %v8055_v58  ;;  %v3121_v32 = vpop.f32.mrb[11].mxu1 }
 0x40c   : > { %v3159_v33 = vmax.f32 %v3147_v27, 0.0  ;;  %v3150_v34 = vadd.f32 %v3121_v32, %v8035_v36  ;;  %v3196_v35 = vadd.f32 %v3179_v26, %v3178_v23  ;;  %v7637_v26 = vld [vmem:[%s8918_s1 + $0x20] sm:$0xff]  }
 0x40d   : > { %v3177_v38 = vmul.f32 %v3165_v30, %v8047_v49  ;;  %v3168_v39 = vmax.f32 %v3156_v31, 0.0  ;;  %v7638_v31 = vld [vmem:[%s8918_s1 + $0x28] sm:$0xff]  }
 0x40e   : > { %v3171_v40 = vmul.f32 %v3159_v33, %v8047_v49  ;;  %v3162_v41 = vmax.f32 %v3150_v34, 0.0 }
 0x40f   : > { %v3180_v42 = vmul.f32 %v3168_v39, %v8047_v49  ;;  %v3192_v43 = vsel %vm1700_vm10, %v3177_v38, 0.0 }
 0x410   : > { %v3174_v44 = vmul.f32 %v3162_v41, %v8047_v49  ;;  %v3193_v45 = vadd.f32 %v3192_v43, %v3191_v29  ;;  %v3182_v46 = vsel %vm1700_vm10, %v3171_v40, 0.0 }
 0x411   : > { %v3183_v48 = vadd.f32 %v3182_v46, %v3181_v7  ;;  %v3197_v53 = vsel %vm1700_vm10, %v3180_v42, 0.0  ;;  %v7640_v42 = vld [vmem:[%s8918_s1 + $0x38] sm:$0xff]   ;;  %v7641_v46 = vld [vmem:[%s8918_s1 + $0x40] sm:$0xff]  }
 0x412   : > { %3194 = vadd.xlane.f32.xlu0 %v3193_v45  ;;  %v3187_v54 = vsel %vm1700_vm10, %v3174_v44, 0.0  ;;  %v3198_v55 = vadd.f32 %v3197_v53, %v3196_v35  ;;  %v7639_v35 = vld [vmem:[%s8918_s1 + $0x30] sm:$0xff]  }
 0x413   : > { %3184 = vadd.xlane.f32.xlu1 %v3183_v48  ;;  %v3188_v56 = vadd.f32 %v3187_v54, %v3186_v13 }
 0x416   : > { %3189 = vadd.xlane.f32.xlu0 %v3188_v56  ;;  %v7642_v56 = vld [vmem:[%s8918_s1 + $0x48] sm:$0xff]  }
 0x417   : > { %3199 = vadd.xlane.f32.xlu1 %v3198_v55 }
 0x428   : > { %3318 = vrot.lane.b32.xlu1 %v6517_v59, %s7683_s8 }
 0x42c   : > { %3316 = vrot.lane.b32.xlu0 %v6516_v60, %s7683_s8  ;;  %3320 = vrot.lane.b32.xlu1 %v8427_v61, %s7683_s8 }
 0x430   : > { %3582 = vrot.lane.b32.xlu0 %v6516_v60, %s7684_s11  ;;  %3584 = vrot.lane.b32.xlu1 %v6517_v59, %s7684_s11 }
 0x434   : > { %3586 = vrot.lane.b32.xlu0 %v8427_v61, %s7684_s11  ;;  %3733 = vrot.lane.b32.xlu1 %v6516_v60, %s7685_s12 }
 0x438   : > { %3735 = vrot.lane.b32.xlu0 %v6517_v59, %s7685_s12  ;;  %3737 = vrot.lane.b32.xlu1 %v8427_v61, %s7685_s12 }
 0x43c   : > { %3884 = vrot.lane.b32.xlu0 %v6516_v60, %s7686_s13  ;;  %3886 = vrot.lane.b32.xlu1 %v6517_v59, %s7686_s13 }
 0x440   : > { %3888 = vrot.lane.b32.xlu0 %v8427_v61, %s7686_s13  ;;  %4035 = vrot.lane.b32.xlu1 %v6516_v60, %s7687_s14 }
 0x444   : > { %4037 = vrot.lane.b32.xlu0 %v6517_v59, %s7687_s14  ;;  %4039 = vrot.lane.b32.xlu1 %v8427_v61, %s7687_s14 }
 0x448   : > { %4186 = vrot.lane.b32.xlu0 %v6516_v60, %s7688_s15  ;;  %4188 = vrot.lane.b32.xlu1 %v6517_v59, %s7688_s15 }
 0x44c   : > { %4190 = vrot.lane.b32.xlu0 %v8427_v61, %s7688_s15  ;;  %4337 = vrot.lane.b32.xlu1 %v6516_v60, %s7689_s16 }
 0x450   : > { %4339 = vrot.lane.b32.xlu0 %v6517_v59, %s7689_s16  ;;  %4341 = vrot.lane.b32.xlu1 %v8427_v61, %s7689_s16 }
 0x454   : > { %4488 = vrot.lane.b32.xlu0 %v6516_v60, %s7690_s17  ;;  %4490 = vrot.lane.b32.xlu1 %v6517_v59, %s7690_s17 }
 0x458   : > { %4492 = vrot.lane.b32.xlu0 %v8427_v61, %s7690_s17 }
 0x49f   : > { %v3195_v62 = vpop.xlane.xlu0 %3194 }
 0x4a0   : > { %v3185_v0 = vpop.xlane.xlu1 %3184 }
 0x4a3   : > { %v3190_v2 = vpop.xlane.xlu0 %3189 }
 0x4a4   : > { %v7123_v3 = vpack.c.bf16 %v3190_v2, %v3185_v0  ;;  %v3200_v4 = vpop.xlane.xlu1 %3199 }
 0x4a5   : > { %v7127_v5 = vpack.c.bf16 %v3200_v4, %v3195_v62  ;;  %v7644_v4 = vld [vmem:[%s8918_s1 + $0x58] sm:$0xff]  }
 0x4a6   : > { %7124 = vmatprep.subr.bf16.mxu0 %v7123_v3 }
 0x4a7   : > { %7126 = vmatpush3.bf16.msra.mxu0 %v7123_v3  ;;  %v3317_v7 = vpop.permute.xlu0 %3316 }
 0x4a8   : > { %7128 = vmatprep.subr.bf16.mxu0 %v7127_v5  ;;  %v3319_v6 = vpop.permute.xlu1 %3318 }
 0x4a9   : > { %v3322_v8 = vsel %vm307_vm2, %v3317_v7, %v3319_v6 }
 0x4aa   : > { %v3331_v11 = vsel %vm317_vm1, %v3322_v8, 0  ;;  %v7645_v8 = vld [vmem:[%s8918_s1 + $0x60] sm:$0xff]  }
 0x4ab   : > { %7130 = vmatpush3.bf16.msra.mxu0 %v7127_v5  ;;  %v3583_v16 = vpop.permute.xlu0 %3582 }
 0x4ac   : > { %v3321_v9 = vpop.permute.xlu1 %3320 }
 0x4ad   : > { %v3323_v10 = vsel %vm307_vm2, %v3319_v6, %v3321_v9  ;;  %v3337_v13 = vsel %vm317_vm1, %v3321_v9, 0 }
 0x4ae   : > { %6983 = vmatmul.mubr.msk.f32.vlgmr.msra.gmra.mrb[20].mxu0 %vm1720_vm11, %v8133_v63  ;;  %6519 = vmatprep.subr.msk.bf16.mxu0 %vm317_vm1, %v3323_v10 }
 0x4af   : > { %3340 = vmatpush1.bf16.msra.mxu0 %v3331_v11  ;;  %3371 = vmatprep.mubr.bf16.mxu0 %v7682_v1  ;;  %v3587_v18 = vpop.permute.xlu0 %3586 }
 0x4b0   : > { %7549 = vmatprep.subr.msk.bf16.mxu0 %vm317_vm1, %v3321_v9  ;;  %v3585_v19 = vpop.permute.xlu1 %3584  ;;  %v3603_v30 = vsel %vm317_vm1, %v3587_v18, 0 }
 0x4b1   : > { %v3589_v21 = vsel %vm577_vm3, %v3585_v19, %v3587_v18  ;;  %v3588_v23 = vsel %vm577_vm3, %v3583_v16, %v3585_v19 }
 0x4b2   : > { %6520 = vmatmul.mubr.msk.bf16.vlgmr.msra.gmra.mrb[24].mxu0 %vm310_vm0, %v7633_v12  ;;  %v3597_v24 = vsel %vm317_vm1, %v3588_v23, 0 }
 0x4b3   : > { %6986 = vmatpush3.bf16.msra.mxu0 %v3337_v13  ;;  %3381 = vmatprep.mubr.bf16.mxu0 %v7682_v1  ;;  %v3736_v27 = vpop.permute.xlu0 %3735  ;;  %v7646_v13 = vld [vmem:[%s8918_s1 + $0x68] sm:$0xff]  }
 0x4b4   : > { %6526 = vmatprep.subr.msk.bf16.mxu0 %vm317_vm1, %v6517_v59  ;;  %v3734_v25 = vpop.permute.xlu1 %3733 }
 0x4b5   : > { %v3739_v32 = vsel %vm730_vm4, %v3734_v25, %v3736_v27  ;;  %v7649_v25 = vld [vmem:[%s8918_s1 + $0x80] sm:$0xff]  }
 0x4b6   : > { %v3748_v33 = vsel %vm317_vm1, %v3739_v32, 0 }
 0x4b7   : > { %v3885_v34 = vpop.permute.xlu0 %3884 }
 0x4b8   : > { %v3738_v28 = vpop.permute.xlu1 %3737 }
 0x4b9   : > { %v3740_v29 = vsel %vm730_vm4, %v3736_v27, %v3738_v28  ;;  %v3754_v41 = vsel %vm317_vm1, %v3738_v28, 0  ;;  %v7650_v27 = vld [vmem:[%s8918_s1 + $0x88] sm:$0xff]  }
 0x4ba   : > { %6521 = vmatmul.mubr.msk.bf16.gmra.mrb[28].mxu0 %vm310_vm0, %v7634_v14 }
 0x4bb   : > { %6987 = vmatprep.mubr.msk.bf16.mxu0 %vm310_vm0, %v7633_v12  ;;  %v3889_v38 = vpop.permute.xlu0 %3888 }
 0x4bc   : > { %v3887_v39 = vpop.permute.xlu1 %3886  ;;  %v3905_v55 = vsel %vm317_vm1, %v3889_v38, 0 }
 0x4bd   : > { %v3891_v40 = vsel %vm883_vm5, %v3887_v39, %v3889_v38  ;;  %v3890_v43 = vsel %vm883_vm5, %v3885_v34, %v3887_v39 }
 0x4be   : > { %v3899_v44 = vsel %vm317_vm1, %v3890_v43, 0 }
 0x4bf   : > { %v4038_v48 = vpop.permute.xlu0 %4037 }
 0x4c0   : > { %v4036_v45 = vpop.permute.xlu1 %4035 }
 0x4c1   : > { %v4041_v57 = vsel %vm1036_vm6, %v4036_v45, %v4038_v48 }
 0x4c2   : > { %6988 = vmatmul.mubr.msk.bf16.vlgmr.msra.gmra.mrb[32].mxu0 %vm310_vm0, %v7634_v14  ;;  %v4050_v59 = vsel %vm317_vm1, %v4041_v57, 0 }
 0x4c3   : > { %3467 = vmatpush1.bf16.msra.mxu0 %v3458_v15  ;;  %3498 = vmatprep.mubr.bf16.mxu0 %v7682_v1  ;;  %v4187_v60 = vpop.permute.xlu0 %4186 }
 0x4c4   : > { %7550 = vmatprep.subr.msk.bf16.mxu0 %vm317_vm1, %v8427_v61  ;;  %v4040_v53 = vpop.permute.xlu1 %4039  ;;  %v7643_v61 = vld [vmem:[%s8918_s1 + $0x50] sm:$0xff]  }
 0x4c5   : > { %v4042_v54 = vsel %vm1036_vm6, %v4038_v48, %v4040_v53  ;;  %v4056_v3 = vsel %vm317_vm1, %v4040_v53, 0 }
 0x4c7   : > { %v4191_v62 = vpop.permute.xlu0 %4190 }
 0x4c8   : > { %v4189_v0 = vpop.permute.xlu1 %4188  ;;  %v4207_v12 = vsel %vm317_vm1, %v4191_v62, 0 }
 0x4c9   : > { %v4193_v2 = vsel %vm1189_vm7, %v4189_v0, %v4191_v62  ;;  %v4192_v5 = vsel %vm1189_vm7, %v4187_v60, %v4189_v0 }
 0x4ca   : > { %6527 = vmatmul.mubr.msk.bf16.vlgmr.msra.gmra.mrb[24].mxu0 %vm310_vm0, %v7635_v17  ;;  %v4201_v6 = vsel %vm317_vm1, %v4192_v5, 0 }
 0x4cb   : > { %3508 = vmatprep.mubr.bf16.mxu0 %v7682_v1  ;;  %6992 = vmatpush3.bf16.msra.mxu0 %v3464_v20  ;;  %v4340_v9 = vpop.permute.xlu0 %4339 }
 0x4cc   : > { %6537 = vmatprep.subr.msk.bf16.mxu0 %vm317_vm1, %v3589_v21  ;;  %v4338_v7 = vpop.permute.xlu1 %4337 }
 0x4cd   : > { %v4343_v14 = vsel %vm1342_vm8, %v4338_v7, %v4340_v9 }
 0x4ce   : > { %v4352_v15 = vsel %vm317_vm1, %v4343_v14, 0 }
 0x4cf   : > { %v4489_v16 = vpop.permute.xlu0 %4488 }
 0x4d0   : > { %v4342_v10 = vpop.permute.xlu1 %4341 }
 0x4d1   : > { %v4344_v11 = vsel %vm1342_vm8, %v4340_v9, %v4342_v10  ;;  %v4358_v21 = vsel %vm317_vm1, %v4342_v10, 0 }
 0x4d2   : > { %6528 = vmatmul.mubr.msk.bf16.gmra.mrb[28].mxu0 %vm310_vm0, %v7636_v22 }
 0x4d3   : > { %6993 = vmatprep.mubr.msk.bf16.mxu0 %vm310_vm0, %v7635_v17  ;;  %v7647_v17 = vld [vmem:[%s8918_s1 + $0x70] sm:$0xff]  }
 0x4d4   : > { %v4491_v19 = vpop.permute.xlu1 %4490 }
 0x4d5   : > { %v4494_v23 = vsel %vm1495_vm9, %v4489_v16, %v4491_v19 }
 0x4da   : > { %6994 = vmatmul.mubr.msk.bf16.vlgmr.msra.gmra.mrb[32].mxu0 %vm310_vm0, %v7636_v22  ;;  %v7648_v22 = vld [vmem:[%s8918_s1 + $0x78] sm:$0xff]  }
 0x4db   : > { %3606 = vmatpush1.bf16.msra.mxu0 %v3597_v24  ;;  %3637 = vmatprep.mubr.bf16.mxu0 %v7682_v1  ;;  %v4503_v24 = vsel %vm317_vm1, %v4494_v23, 0 }
 0x4dc   : > { %7551 = vmatprep.subr.msk.bf16.mxu0 %vm317_vm1, %v3587_v18  ;;  %v4493_v18 = vpop.permute.xlu0 %4492 }
 0x4dd   : > { %v4495_v20 = vsel %vm1495_vm9, %v4491_v19, %v4493_v18 }
 0x4e2   : > { %6538 = vmatmul.mubr.msk.bf16.vlgmr.msra.gmra.mrb[24].mxu0 %vm310_vm0, %v7637_v26 }
 0x4e3   : > { %6998 = vmatpush3.bf16.msra.mxu0 %v3603_v30  ;;  %3647 = vmatprep.mubr.bf16.mxu0 %v7682_v1 }
 0x4e4   : > { %6548 = vmatprep.subr.msk.bf16.mxu0 %vm317_vm1, %v3740_v29 }
 0x4ea   : > { %6539 = vmatmul.mubr.msk.bf16.gmra.mrb[28].mxu0 %vm310_vm0, %v7638_v31 }
 0x4eb   : > { %6999 = vmatprep.mubr.msk.bf16.mxu0 %vm310_vm0, %v7637_v26  ;;  %v4509_v26 = vsel %vm317_vm1, %v4493_v18, 0 }
 0x4f2   : > { %7000 = vmatmul.mubr.msk.bf16.vlgmr.msra.gmra.mrb[32].mxu0 %vm310_vm0, %v7638_v31 }
 0x4f3   : > { %3757 = vmatpush1.bf16.msra.mxu0 %v3748_v33  ;;  %3788 = vmatprep.mubr.bf16.mxu0 %v7682_v1 }
 0x4f4   : > { %7552 = vmatprep.subr.msk.bf16.mxu0 %vm317_vm1, %v3738_v28 }
 0x4fa   : > { %6549 = vmatmul.mubr.msk.bf16.vlgmr.msra.gmra.mrb[24].mxu0 %vm310_vm0, %v7639_v35 }
 0x4fb   : > { %7004 = vmatpush3.bf16.msra.mxu0 %v3754_v41  ;;  %3798 = vmatprep.mubr.bf16.mxu0 %v7682_v1 }
 0x4fc   : > { %6559 = vmatprep.subr.msk.bf16.mxu0 %vm317_vm1, %v3891_v40 }
 0x502   : > { %6550 = vmatmul.mubr.msk.bf16.gmra.mrb[28].mxu0 %vm310_vm0, %v7640_v42 }
 0x503   : > { %7005 = vmatprep.mubr.msk.bf16.mxu0 %vm310_vm0, %v7639_v35 }
 0x50a   : > { %7006 = vmatmul.mubr.msk.bf16.vlgmr.msra.gmra.mrb[32].mxu0 %vm310_vm0, %v7640_v42 }
 0x50b   : > { %3908 = vmatpush1.bf16.msra.mxu0 %v3899_v44  ;;  %3939 = vmatprep.mubr.bf16.mxu0 %v7682_v1 }
 0x50c   : > { %7553 = vmatprep.subr.msk.bf16.mxu0 %vm317_vm1, %v3889_v38 }
 0x512   : > { %6560 = vmatmul.mubr.msk.bf16.vlgmr.msra.gmra.mrb[24].mxu0 %vm310_vm0, %v7641_v46 }
 0x513   : > { %7010 = vmatpush3.bf16.msra.mxu0 %v3905_v55  ;;  %3949 = vmatprep.mubr.bf16.mxu0 %v7682_v1 }
 0x514   : > { %6570 = vmatprep.subr.msk.bf16.mxu0 %vm317_vm1, %v4042_v54 }
 0x51a   : > { %6561 = vmatmul.mubr.msk.bf16.gmra.mrb[28].mxu0 %vm310_vm0, %v7642_v56 }
 0x51b   : > { %7011 = vmatprep.mubr.msk.bf16.mxu0 %vm310_vm0, %v7641_v46 }
 0x522   : > { %7012 = vmatmul.mubr.msk.bf16.vlgmr.msra.gmra.mrb[32].mxu0 %vm310_vm0, %v7642_v56 }
 0x523   : > { %4059 = vmatpush1.bf16.msra.mxu0 %v4050_v59  ;;  %4090 = vmatprep.mubr.bf16.mxu0 %v7682_v1 }
 0x524   : > { %7554 = vmatprep.subr.msk.bf16.mxu0 %vm317_vm1, %v4040_v53 }
 0x52a   : > { %6571 = vmatmul.mubr.msk.bf16.vlgmr.msra.gmra.mrb[24].mxu0 %vm310_vm0, %v7643_v61 }
 0x52b   : > { %7016 = vmatpush3.bf16.msra.mxu0 %v4056_v3  ;;  %4100 = vmatprep.mubr.bf16.mxu0 %v7682_v1 }
 0x52c   : > { %6581 = vmatprep.subr.msk.bf16.mxu0 %vm317_vm1, %v4193_v2 }
 0x532   : > { %6572 = vmatmul.mubr.msk.bf16.gmra.mrb[28].mxu0 %vm310_vm0, %v7644_v4 }
 0x533   : > { %7017 = vmatprep.mubr.msk.bf16.mxu0 %vm310_vm0, %v7643_v61 }
 0x53a   : > { %7018 = vmatmul.mubr.msk.bf16.vlgmr.msra.gmra.mrb[32].mxu0 %vm310_vm0, %v7644_v4 }
 0x53b   : > { %4210 = vmatpush1.bf16.msra.mxu0 %v4201_v6  ;;  %4241 = vmatprep.mubr.bf16.mxu0 %v7682_v1 }
 0x53c   : > { %7555 = vmatprep.subr.msk.bf16.mxu0 %vm317_vm1, %v4191_v62 }
 0x542   : > { %6582 = vmatmul.mubr.msk.bf16.vlgmr.msra.gmra.mrb[24].mxu0 %vm310_vm0, %v7645_v8 }
 0x543   : > { %7022 = vmatpush3.bf16.msra.mxu0 %v4207_v12  ;;  %4251 = vmatprep.mubr.bf16.mxu0 %v7682_v1 }
 0x544   : > { %6592 = vmatprep.subr.msk.bf16.mxu0 %vm317_vm1, %v4344_v11 }
 0x54a   : > { %6583 = vmatmul.mubr.msk.bf16.gmra.mrb[28].mxu0 %vm310_vm0, %v7646_v13 }
 0x54b   : > { %7023 = vmatprep.mubr.msk.bf16.mxu0 %vm310_vm0, %v7645_v8 }
 0x552   : > { %7024 = vmatmul.mubr.msk.bf16.vlgmr.msra.gmra.mrb[32].mxu0 %vm310_vm0, %v7646_v13 }
 0x553   : > { %4361 = vmatpush1.bf16.msra.mxu0 %v4352_v15  ;;  %4392 = vmatprep.mubr.bf16.mxu0 %v7682_v1 }
 0x554   : > { %7556 = vmatprep.subr.msk.bf16.mxu0 %vm317_vm1, %v4342_v10 }
 0x55a   : > { %6593 = vmatmul.mubr.msk.bf16.vlgmr.msra.gmra.mrb[24].mxu0 %vm310_vm0, %v7647_v17 }
 0x55b   : > { %7028 = vmatpush3.bf16.msra.mxu0 %v4358_v21  ;;  %4402 = vmatprep.mubr.bf16.mxu0 %v7682_v1 }
 0x55c   : > { %6603 = vmatprep.subr.msk.bf16.mxu0 %vm317_vm1, %v4495_v20 }
 0x562   : > { %6594 = vmatmul.mubr.msk.bf16.gmra.mrb[28].mxu0 %vm310_vm0, %v7648_v22 }
 0x563   : > { %7029 = vmatprep.mubr.msk.bf16.mxu0 %vm310_vm0, %v7647_v17 }
 0x56a   : > { %7030 = vmatmul.mubr.msk.bf16.vlgmr.msra.gmra.mrb[32].mxu0 %vm310_vm0, %v7648_v22 }
 0x56b   : > { %4512 = vmatpush1.bf16.msra.mxu0 %v4503_v24  ;;  %4543 = vmatprep.mubr.bf16.mxu0 %v7682_v1 }
 0x56c   : > { %7557 = vmatprep.subr.msk.bf16.mxu0 %vm317_vm1, %v4493_v18 }
 0x572   : > { %6604 = vmatmul.mubr.msk.bf16.vlgmr.msra.gmra.mrb[24].mxu0 %vm310_vm0, %v7649_v25 }
 0x573   : > { %7034 = vmatpush3.bf16.msra.mxu0 %v4509_v26  ;;  %4553 = vmatprep.mubr.bf16.mxu0 %v7682_v1 }
 0x57a   : > { %6605 = vmatmul.mubr.msk.bf16.gmra.mrb[28].mxu0 %vm310_vm0, %v7650_v27 }
 0x57b   : > { %7035 = vmatprep.mubr.msk.bf16.mxu0 %vm310_vm0, %v7649_v25 }
 0x581   : > { %v8623_v28 = vpop.f32.mrb[20].mxu0 }
 0x582   : > { %7036 = vmatmul.mubr.msk.bf16.vlgmr.msra.gmra.mrb[32].mxu0 %vm310_vm0, %v7650_v27  ;;  %v8626_v29 = vpop.f32.mrb[21].mxu0 }
 0x583   : > { %7112 = vmatprep.mubr.msk.f32.mxu0 %vm1720_vm11, %v8086_v51 }
 0x645   : > { %v4545_v30 = vpop.f32.mrb[24].mxu0 }
 0x646   : > { %v4625_v31 = vadd.f32 %v4545_v30, %v8037_v37  ;;  %v4547_v32 = vpop.f32.mrb[25].mxu0 }
 0x647   : > { %v4626_v33 = vadd.f32 %v4547_v32, %v8037_v37  ;;  %v4549_v34 = vpop.f32.mrb[26].mxu0 }
 0x648   : > { %v4637_v35 = vmax.f32 %v4625_v31, 0.0  ;;  %v4628_v38 = vadd.f32 %v4549_v34, %v8035_v36  ;;  %v4551_v39 = vpop.f32.mrb[27].mxu0 }
 0x649   : > { %v4638_v40 = vmax.f32 %v4626_v33, 0.0  ;;  %v4629_v41 = vadd.f32 %v4551_v39, %v8035_v36  ;;  %v6612_v39 = vld [vmem:[%s7748_s29 + $0xc] sm:$0xcc] }
 0x64a   : > { %v4649_v42 = vmul.f32 %v4637_v35, %v8045_v47  ;;  %v4640_v43 = vmax.f32 %v4628_v38, 0.0 }
 0x64b   : > { %v4650_v44 = vmul.f32 %v4638_v40, %v8052_v52  ;;  %v4641_v51 = vmax.f32 %v4629_v41, 0.0  ;;  %v6621_v40 = vcombine.high %v6612_v39, %v6612_v39 }
 0x64c   : > { %v4652_v45 = vmul.f32 %v4640_v43, %v8045_v47  ;;  %v6620_v43 = vcombine.low %v6612_v39, %v6612_v39 }
 0x64d   : > { %v4653_v46 = vmul.f32 %v4641_v51, %v8052_v52  ;;  %v4555_v48 = vpop.f32.mrb[28].mxu0  ;;  %v4661_v53 = vadd.f32 %v4650_v44, %v4649_v42  ;;  %v4788_v41 = vrot.slane %v6621_v40, 2  ;;  %v7652_v42 = vld [vmem:[%s7748_s29 + $0x14] ss:$0 sps:$4 sm:$0xcc]  }
 0x64e   : > { %v4631_v54 = vadd.f32 %v4555_v48, %v8049_v50  ;;  %v4557_v55 = vpop.f32.mrb[29].mxu0  ;;  %v8661_v44 = vrot.slane %v7652_v42, 2  ;;  %v4787_v51 = vrot.slane %v6620_v43, 2  ;;  %v7663_v42 = vld [vmem:[%s8918_s1 + $0x48] sm:$0xff]  }
 0x64f   : > { %v4632_v56 = vadd.f32 %v4557_v55, %v8049_v50  ;;  %v4559_v57 = vpop.f32.mrb[30].mxu0  ;;  %v4666_v59 = vadd.f32 %v4653_v46, %v4652_v45 }
 0x650   : > { %v4643_v60 = vmax.f32 %v4631_v54, 0.0  ;;  %v4634_v61 = vadd.f32 %v4559_v57, %v8055_v58  ;;  %v4561_v62 = vpop.f32.mrb[31].mxu0 }
 0x651   : > { %v4644_v0 = vmax.f32 %v4632_v56, 0.0  ;;  %v4635_v2 = vadd.f32 %v4561_v62, %v8055_v58 }
 0x652   : > { %v4655_v3 = vmul.f32 %v4643_v60, %v8045_v47  ;;  %v4646_v4 = vmax.f32 %v4634_v61, 0.0 }
 0x653   : > { %v4656_v5 = vmul.f32 %v4644_v0, %v8052_v52  ;;  %v4647_v6 = vmax.f32 %v4635_v2, 0.0  ;;  %v7654_v0 = vld [vmem:[%s8918_s1 + $0x10] sm:$0xff]  }
 0x654   : > { %v4658_v7 = vmul.f32 %v4646_v4, %v8045_v47  ;;  %v4932_v4 = vsel %vm317_vm1, %v4787_v51, 0 }
 0x655   : > { %v4659_v8 = vmul.f32 %v4647_v6, %v8052_v52  ;;  %v7037_v9 = vpop.f32.mrb[32].mxu0  ;;  %v4671_v10 = vadd.f32 %v4656_v5, %v4655_v3  ;;  %v7655_v3 = vld [vmem:[%s8918_s1 + $0x18] sm:$0xff]   ;;  %v7656_v6 = vld [vmem:[%s8918_s1] sm:$0xff]  }
 0x656   : > { %v4633_v11 = vadd.f32 %v7037_v9, %v8049_v50  ;;  %v4598_v12 = vpop.f32.mrb[33].mxu0  ;;  %v4938_v9 = vsel %vm317_vm1, %v8661_v44, 0 }
 0x657   : > { %v4627_v13 = vadd.f32 %v4598_v12, %v8037_v37  ;;  %v7038_v14 = vpop.f32.mrb[34].mxu0  ;;  %v4676_v15 = vadd.f32 %v4659_v8, %v4658_v7 }
 0x658   : > { %v4645_v16 = vmax.f32 %v4633_v11, 0.0  ;;  %v4636_v17 = vadd.f32 %v7038_v14, %v8055_v58  ;;  %v4601_v18 = vpop.f32.mrb[35].mxu0  ;;  %v7657_v11 = vld [vmem:[%s8918_s1 + $0x8] sm:$0xff]  }
 0x659   : > { %v4639_v19 = vmax.f32 %v4627_v13, 0.0  ;;  %v4630_v20 = vadd.f32 %v4601_v18, %v8035_v36 }
 0x65a   : > { %v4657_v21 = vmul.f32 %v4645_v16, %v8047_v49  ;;  %v4648_v22 = vmax.f32 %v4636_v17, 0.0 }
 0x65b   : > { %v4651_v23 = vmul.f32 %v4639_v19, %v8047_v49  ;;  %v4642_v24 = vmax.f32 %v4630_v20, 0.0  ;;  %v7659_v20 = vld [vmem:[%s8918_s1 + $0x28] sm:$0xff]  }
 0x65c   : > { %v4660_v25 = vmul.f32 %v4648_v22, %v8047_v49  ;;  %v4672_v26 = vsel %vm1700_vm10, %v4657_v21, 0.0 }
 0x65d   : > { %v4654_v27 = vmul.f32 %v4642_v24, %v8047_v49  ;;  %v4673_v30 = vadd.f32 %v4672_v26, %v4671_v10  ;;  %v4662_v31 = vsel %vm1700_vm10, %v4651_v23, 0.0  ;;  %v7660_v24 = vld [vmem:[%s8918_s1 + $0x30] sm:$0xff]  }
 0x65e   : > { %v4663_v32 = vadd.f32 %v4662_v31, %v4661_v53  ;;  %v4677_v33 = vsel %vm1700_vm10, %v4660_v25, 0.0  ;;  %v7661_v31 = vld [vmem:[%s8918_s1 + $0x38] sm:$0xff]  }
 0x65f   : > { %4674 = vadd.xlane.f32.xlu0 %v4673_v30  ;;  %v4667_v34 = vsel %vm1700_vm10, %v4654_v27, 0.0  ;;  %v4678_v35 = vadd.f32 %v4677_v33, %v4676_v15  ;;  %v7658_v15 = vld [vmem:[%s8918_s1 + $0x20] sm:$0xff]  }
 0x660   : > { %4664 = vadd.xlane.f32.xlu1 %v4663_v32  ;;  %v4668_v38 = vadd.f32 %v4667_v34, %v4666_v59 }
 0x663   : > { %4669 = vadd.xlane.f32.xlu0 %v4668_v38 }
 0x664   : > { %4679 = vadd.xlane.f32.xlu1 %v4678_v35  ;;  %v7662_v35 = vld [vmem:[%s8918_s1 + $0x40] sm:$0xff]  }
 0x675   : > { %4792 = vrot.lane.b32.xlu1 %v4788_v41, %s7683_s8 }
 0x679   : > { %4794 = vrot.lane.b32.xlu1 %v8661_v44, %s7683_s8  ;;  %4790 = vrot.lane.b32.xlu0 %v4787_v51, %s7683_s8 }
 0x67d   : > { %5056 = vrot.lane.b32.xlu0 %v4787_v51, %s7684_s11  ;;  %5058 = vrot.lane.b32.xlu1 %v4788_v41, %s7684_s11 }
 0x681   : > { %5060 = vrot.lane.b32.xlu0 %v8661_v44, %s7684_s11  ;;  %5207 = vrot.lane.b32.xlu1 %v4787_v51, %s7685_s12 }
 0x685   : > { %5211 = vrot.lane.b32.xlu1 %v8661_v44, %s7685_s12  ;;  %5209 = vrot.lane.b32.xlu0 %v4788_v41, %s7685_s12 }
 0x689   : > { %5358 = vrot.lane.b32.xlu0 %v4787_v51, %s7686_s13  ;;  %5360 = vrot.lane.b32.xlu1 %v4788_v41, %s7686_s13 }
 0x68d   : > { %5362 = vrot.lane.b32.xlu0 %v8661_v44, %s7686_s13  ;;  %5509 = vrot.lane.b32.xlu1 %v4787_v51, %s7687_s14 }
 0x691   : > { %5513 = vrot.lane.b32.xlu1 %v8661_v44, %s7687_s14  ;;  %5511 = vrot.lane.b32.xlu0 %v4788_v41, %s7687_s14 }
 0x695   : > { %5660 = vrot.lane.b32.xlu0 %v4787_v51, %s7688_s15  ;;  %5662 = vrot.lane.b32.xlu1 %v4788_v41, %s7688_s15 }
 0x699   : > { %5664 = vrot.lane.b32.xlu0 %v8661_v44, %s7688_s15  ;;  %5811 = vrot.lane.b32.xlu1 %v4787_v51, %s7689_s16 }
 0x69d   : > { %5815 = vrot.lane.b32.xlu1 %v8661_v44, %s7689_s16  ;;  %5813 = vrot.lane.b32.xlu0 %v4788_v41, %s7689_s16 }
 0x6a1   : > { %5962 = vrot.lane.b32.xlu0 %v4787_v51, %s7690_s17  ;;  %5964 = vrot.lane.b32.xlu1 %v4788_v41, %s7690_s17 }
 0x6a5   : > { %5966 = vrot.lane.b32.xlu0 %v8661_v44, %s7690_s17 }
 0x6ec   : > { %v4675_v45 = vpop.xlane.xlu0 %4674 }
 0x6ed   : > { %v4665_v46 = vpop.xlane.xlu1 %4664 }
 0x6f0   : > { %v4670_v48 = vpop.xlane.xlu0 %4669 }
 0x6f1   : > { %v7131_v53 = vpack.c.bf16 %v4670_v48, %v4665_v46  ;;  %v4680_v54 = vpop.xlane.xlu1 %4679 }
 0x6f2   : > { %v7135_v55 = vpack.c.bf16 %v4680_v54, %v4675_v45  ;;  %v7664_v45 = vld [vmem:[%s8918_s1 + $0x50] sm:$0xff]  }
 0x6f3   : > { %7132 = vmatprep.subr.bf16.mxu1 %v7131_v53 }
 0x6f4   : > { %7134 = vmatpush3.bf16.msra.mxu1 %v7131_v53  ;;  %v4791_v57 = vpop.permute.xlu0 %4790 }
 0x6f5   : > { %v4793_v56 = vpop.permute.xlu1 %4792  ;;  %7136 = vmatprep.subr.bf16.mxu1 %v7135_v55 }
 0x6f6   : > { %v4796_v59 = vsel %vm307_vm2, %v4791_v57, %v4793_v56 }
 0x6f7   : > { %v4805_v62 = vsel %vm317_vm1, %v4796_v59, 0 }
 0x6f8   : > { %7138 = vmatpush3.bf16.msra.mxu1 %v7135_v55  ;;  %v5057_v5 = vpop.permute.xlu0 %5056  ;;  %v7665_v55 = vld [vmem:[%s8918_s1 + $0x58] sm:$0xff]  }
 0x6f9   : > { %v4795_v60 = vpop.permute.xlu1 %4794 }
 0x6fa   : > { %v4797_v61 = vsel %vm307_vm2, %v4793_v56, %v4795_v60  ;;  %v4811_v2 = vsel %vm317_vm1, %v4795_v60, 0 }
 0x6fb   : > { %7048 = vmatmul.mubr.msk.f32.vlgmr.msra.gmra.mrb[6].mxu1 %vm1720_vm11, %v8133_v63  ;;  %6623 = vmatprep.subr.msk.bf16.mxu1 %vm317_vm1, %v4797_v61 }
 0x6fc   : > { %4814 = vmatpush1.bf16.msra.mxu1 %v4805_v62  ;;  %4845 = vmatprep.mubr.bf16.mxu1 %v7682_v1  ;;  %v5061_v8 = vpop.permute.xlu0 %5060 }
 0x6fd   : > { %7558 = vmatprep.subr.msk.bf16.mxu1 %vm317_vm1, %v4795_v60  ;;  %v5059_v7 = vpop.permute.xlu1 %5058  ;;  %v5077_v19 = vsel %vm317_vm1, %v5061_v8, 0  ;;  %v7666_v60 = vld [vmem:[%s8918_s1 + $0x60] sm:$0xff]  }
 0x6fe   : > { %v5063_v10 = vsel %vm577_vm3, %v5059_v7, %v5061_v8  ;;  %v5062_v12 = vsel %vm577_vm3, %v5057_v5, %v5059_v7  ;;  %v7668_v7 = vld [vmem:[%s8918_s1 + $0x70] sm:$0xff]  }
 0x6ff   : > { %6624 = vmatmul.mubr.msk.bf16.vlgmr.msra.gmra.mrb[20].mxu1 %vm310_vm0, %v7654_v0  ;;  %v5071_v13 = vsel %vm317_vm1, %v5062_v12, 0  ;;  %v7669_v12 = vld [vmem:[%s8918_s1 + $0x78] sm:$0xff]  }
 0x700   : > { %7051 = vmatpush3.bf16.msra.mxu1 %v4811_v2  ;;  %4855 = vmatprep.mubr.bf16.mxu1 %v7682_v1  ;;  %v5210_v17 = vpop.permute.xlu0 %5209 }
 0x701   : > { %6630 = vmatprep.subr.msk.bf16.mxu1 %vm317_vm1, %v4788_v41  ;;  %v5208_v14 = vpop.permute.xlu1 %5207 }
 0x702   : > { %v5213_v21 = vsel %vm730_vm4, %v5208_v14, %v5210_v17 }
 0x703   : > { %v5222_v22 = vsel %vm317_vm1, %v5213_v21, 0 }
 0x704   : > { %v5359_v23 = vpop.permute.xlu0 %5358 }
 0x705   : > { %v5212_v16 = vpop.permute.xlu1 %5211 }
 0x706   : > { %v5214_v18 = vsel %vm730_vm4, %v5210_v17, %v5212_v16  ;;  %v5228_v30 = vsel %vm317_vm1, %v5212_v16, 0  ;;  %v7671_v17 = vld [vmem:[%s8918_s1 + $0x88] sm:$0xff]  }
 0x707   : > { %6625 = vmatmul.mubr.msk.bf16.gmra.mrb[24].mxu1 %vm310_vm0, %v7655_v3 }
 0x708   : > { %7052 = vmatprep.mubr.msk.bf16.mxu1 %vm310_vm0, %v7654_v0  ;;  %v5363_v26 = vpop.permute.xlu0 %5362 }
 0x709   : > { %v5361_v25 = vpop.permute.xlu1 %5360  ;;  %v5379_v41 = vsel %vm317_vm1, %v5363_v26, 0 }
 0x70a   : > { %v5365_v27 = vsel %vm883_vm5, %v5361_v25, %v5363_v26  ;;  %v5364_v32 = vsel %vm883_vm5, %v5359_v23, %v5361_v25 }
 0x70b   : > { %v5373_v33 = vsel %vm317_vm1, %v5364_v32, 0 }
 0x70c   : > { %v5512_v39 = vpop.permute.xlu0 %5511 }
 0x70d   : > { %v5510_v34 = vpop.permute.xlu1 %5509 }
 0x70e   : > { %v5515_v43 = vsel %vm1036_vm6, %v5510_v34, %v5512_v39 }
 0x70f   : > { %7053 = vmatmul.mubr.msk.bf16.vlgmr.msra.gmra.mrb[28].mxu1 %vm310_vm0, %v7655_v3  ;;  %v7667_v3 = vld [vmem:[%s8918_s1 + $0x68] sm:$0xff]  }
 0x710   : > { %4941 = vmatpush1.bf16.msra.mxu1 %v4932_v4  ;;  %4972 = vmatprep.mubr.bf16.mxu1 %v7682_v1  ;;  %v5661_v51 = vpop.permute.xlu0 %5660 }
 0x711   : > { %7559 = vmatprep.subr.msk.bf16.mxu1 %vm317_vm1, %v8661_v44  ;;  %v5514_v38 = vpop.permute.xlu1 %5513  ;;  %v5524_v44 = vsel %vm317_vm1, %v5515_v43, 0 }
 0x712   : > { %v5516_v40 = vsel %vm1036_vm6, %v5512_v39, %v5514_v38  ;;  %v5530_v54 = vsel %vm317_vm1, %v5514_v38, 0 }
 0x714   : > { %v5665_v48 = vpop.permute.xlu0 %5664 }
 0x715   : > { %v5663_v46 = vpop.permute.xlu1 %5662  ;;  %v5681_v2 = vsel %vm317_vm1, %v5665_v48, 0 }
 0x716   : > { %v5667_v53 = vsel %vm1189_vm7, %v5663_v46, %v5665_v48  ;;  %v5666_v56 = vsel %vm1189_vm7, %v5661_v51, %v5663_v46 }
 0x717   : > { %6631 = vmatmul.mubr.msk.bf16.vlgmr.msra.gmra.mrb[20].mxu1 %vm310_vm0, %v7656_v6  ;;  %v5675_v57 = vsel %vm317_vm1, %v5666_v56, 0 }
 0x718   : > { %4982 = vmatprep.mubr.bf16.mxu1 %v7682_v1  ;;  %7057 = vmatpush3.bf16.msra.mxu1 %v4938_v9  ;;  %v5814_v62 = vpop.permute.xlu0 %5813 }
 0x719   : > { %6641 = vmatprep.subr.msk.bf16.mxu1 %vm317_vm1, %v5063_v10  ;;  %v5812_v59 = vpop.permute.xlu1 %5811 }
 0x71a   : > { %v5817_v4 = vsel %vm1342_vm8, %v5812_v59, %v5814_v62 }
 0x71b   : > { %v5826_v5 = vsel %vm317_vm1, %v5817_v4, 0 }
 0x71d   : > { %v5816_v61 = vpop.permute.xlu1 %5815 }
 0x71e   : > { %v5818_v0 = vsel %vm1342_vm8, %v5814_v62, %v5816_v61 }
 0x71f   : > { %6632 = vmatmul.mubr.msk.bf16.gmra.mrb[24].mxu1 %vm310_vm0, %v7657_v11 }
 0x720   : > { %7058 = vmatprep.mubr.msk.bf16.mxu1 %vm310_vm0, %v7656_v6  ;;  %v5963_v6 = vpop.permute.xlu0 %5962 }
 0x724   : > { %v5967_v9 = vpop.permute.xlu0 %5966 }
 0x727   : > { %7059 = vmatmul.mubr.msk.bf16.vlgmr.msra.gmra.mrb[28].mxu1 %vm310_vm0, %v7657_v11  ;;  %v5832_v11 = vsel %vm317_vm1, %v5816_v61, 0 }
 0x728   : > { %5080 = vmatpush1.bf16.msra.mxu1 %v5071_v13  ;;  %5111 = vmatprep.mubr.bf16.mxu1 %v7682_v1 }
 0x729   : > { %7560 = vmatprep.subr.msk.bf16.mxu1 %vm317_vm1, %v5061_v8  ;;  %v5965_v8 = vpop.permute.xlu1 %5964 }
 0x72a   : > { %v5969_v10 = vsel %vm1495_vm9, %v5965_v8, %v5967_v9  ;;  %v5968_v13 = vsel %vm1495_vm9, %v5963_v6, %v5965_v8 }
 0x72b   : > { %v5977_v14 = vsel %vm317_vm1, %v5968_v13, 0 }
 0x72f   : > { %6642 = vmatmul.mubr.msk.bf16.vlgmr.msra.gmra.mrb[20].mxu1 %vm310_vm0, %v7658_v15 }
 0x730   : > { %7063 = vmatpush3.bf16.msra.mxu1 %v5077_v19  ;;  %5121 = vmatprep.mubr.bf16.mxu1 %v7682_v1 }
 0x731   : > { %6652 = vmatprep.subr.msk.bf16.mxu1 %vm317_vm1, %v5214_v18 }
 0x737   : > { %6643 = vmatmul.mubr.msk.bf16.gmra.mrb[24].mxu1 %vm310_vm0, %v7659_v20 }
 0x738   : > { %7064 = vmatprep.mubr.msk.bf16.mxu1 %vm310_vm0, %v7658_v15  ;;  %v7670_v15 = vld [vmem:[%s8918_s1 + $0x80] sm:$0xff]  }
 0x73f   : > { %7065 = vmatmul.mubr.msk.bf16.vlgmr.msra.gmra.mrb[28].mxu1 %vm310_vm0, %v7659_v20 }
 0x740   : > { %5231 = vmatpush1.bf16.msra.mxu1 %v5222_v22  ;;  %5262 = vmatprep.mubr.bf16.mxu1 %v7682_v1 }
 0x741   : > { %7561 = vmatprep.subr.msk.bf16.mxu1 %vm317_vm1, %v5212_v16  ;;  %v5983_v16 = vsel %vm317_vm1, %v5967_v9, 0 }
 0x747   : > { %6653 = vmatmul.mubr.msk.bf16.vlgmr.msra.gmra.mrb[20].mxu1 %vm310_vm0, %v7660_v24 }
 0x748   : > { %7069 = vmatpush3.bf16.msra.mxu1 %v5228_v30  ;;  %5272 = vmatprep.mubr.bf16.mxu1 %v7682_v1 }
 0x749   : > { %6663 = vmatprep.subr.msk.bf16.mxu1 %vm317_vm1, %v5365_v27 }
 0x74f   : > { %6654 = vmatmul.mubr.msk.bf16.gmra.mrb[24].mxu1 %vm310_vm0, %v7661_v31 }
 0x750   : > { %7070 = vmatprep.mubr.msk.bf16.mxu1 %vm310_vm0, %v7660_v24 }
 0x757   : > { %7071 = vmatmul.mubr.msk.bf16.vlgmr.msra.gmra.mrb[28].mxu1 %vm310_vm0, %v7661_v31 }
 0x758   : > { %5382 = vmatpush1.bf16.msra.mxu1 %v5373_v33  ;;  %5413 = vmatprep.mubr.bf16.mxu1 %v7682_v1 }
 0x759   : > { %7562 = vmatprep.subr.msk.bf16.mxu1 %vm317_vm1, %v5363_v26 }
 0x75f   : > { %6664 = vmatmul.mubr.msk.bf16.vlgmr.msra.gmra.mrb[20].mxu1 %vm310_vm0, %v7662_v35 }
 0x760   : > { %7075 = vmatpush3.bf16.msra.mxu1 %v5379_v41  ;;  %5423 = vmatprep.mubr.bf16.mxu1 %v7682_v1 }
 0x761   : > { %6674 = vmatprep.subr.msk.bf16.mxu1 %vm317_vm1, %v5516_v40 }
 0x767   : > { %6665 = vmatmul.mubr.msk.bf16.gmra.mrb[24].mxu1 %vm310_vm0, %v7663_v42 }
 0x768   : > { %7076 = vmatprep.mubr.msk.bf16.mxu1 %vm310_vm0, %v7662_v35 }
 0x76f   : > { %7077 = vmatmul.mubr.msk.bf16.vlgmr.msra.gmra.mrb[28].mxu1 %vm310_vm0, %v7663_v42 }
 0x770   : > { %5533 = vmatpush1.bf16.msra.mxu1 %v5524_v44  ;;  %5564 = vmatprep.mubr.bf16.mxu1 %v7682_v1 }
 0x771   : > { %7563 = vmatprep.subr.msk.bf16.mxu1 %vm317_vm1, %v5514_v38 }
 0x777   : > { %6675 = vmatmul.mubr.msk.bf16.vlgmr.msra.gmra.mrb[20].mxu1 %vm310_vm0, %v7664_v45 }
 0x778   : > { %7081 = vmatpush3.bf16.msra.mxu1 %v5530_v54  ;;  %5574 = vmatprep.mubr.bf16.mxu1 %v7682_v1 }
 0x779   : > { %6685 = vmatprep.subr.msk.bf16.mxu1 %vm317_vm1, %v5667_v53 }
 0x77f   : > { %6676 = vmatmul.mubr.msk.bf16.gmra.mrb[24].mxu1 %vm310_vm0, %v7665_v55 }
 0x780   : > { %7082 = vmatprep.mubr.msk.bf16.mxu1 %vm310_vm0, %v7664_v45 }
 0x787   : > { %7083 = vmatmul.mubr.msk.bf16.vlgmr.msra.gmra.mrb[28].mxu1 %vm310_vm0, %v7665_v55 }
 0x788   : > { %5684 = vmatpush1.bf16.msra.mxu1 %v5675_v57  ;;  %5715 = vmatprep.mubr.bf16.mxu1 %v7682_v1 }
 0x789   : > { %7564 = vmatprep.subr.msk.bf16.mxu1 %vm317_vm1, %v5665_v48 }
 0x78f   : > { %6686 = vmatmul.mubr.msk.bf16.vlgmr.msra.gmra.mrb[20].mxu1 %vm310_vm0, %v7666_v60 }
 0x790   : > { %7087 = vmatpush3.bf16.msra.mxu1 %v5681_v2  ;;  %5725 = vmatprep.mubr.bf16.mxu1 %v7682_v1 }
 0x791   : > { %6696 = vmatprep.subr.msk.bf16.mxu1 %vm317_vm1, %v5818_v0 }
 0x797   : > { %6687 = vmatmul.mubr.msk.bf16.gmra.mrb[24].mxu1 %vm310_vm0, %v7667_v3 }
 0x798   : > { %7088 = vmatprep.mubr.msk.bf16.mxu1 %vm310_vm0, %v7666_v60 }
 0x79f   : > { %7089 = vmatmul.mubr.msk.bf16.vlgmr.msra.gmra.mrb[28].mxu1 %vm310_vm0, %v7667_v3 }
 0x7a0   : > { %5835 = vmatpush1.bf16.msra.mxu1 %v5826_v5  ;;  %5866 = vmatprep.mubr.bf16.mxu1 %v7682_v1 }
 0x7a1   : > { %7565 = vmatprep.subr.msk.bf16.mxu1 %vm317_vm1, %v5816_v61 }
 0x7a7   : > { %6697 = vmatmul.mubr.msk.bf16.vlgmr.msra.gmra.mrb[20].mxu1 %vm310_vm0, %v7668_v7 }
 0x7a8   : > { %7093 = vmatpush3.bf16.msra.mxu1 %v5832_v11  ;;  %5876 = vmatprep.mubr.bf16.mxu1 %v7682_v1 }
 0x7a9   : > { %6707 = vmatprep.subr.msk.bf16.mxu1 %vm317_vm1, %v5969_v10 }
 0x7af   : > { %6698 = vmatmul.mubr.msk.bf16.gmra.mrb[24].mxu1 %vm310_vm0, %v7669_v12 }
 0x7b0   : > { %7094 = vmatprep.mubr.msk.bf16.mxu1 %vm310_vm0, %v7668_v7 }
 0x7b7   : > { %7095 = vmatmul.mubr.msk.bf16.vlgmr.msra.gmra.mrb[28].mxu1 %vm310_vm0, %v7669_v12 }
 0x7b8   : > { %5986 = vmatpush1.bf16.msra.mxu1 %v5977_v14  ;;  %6017 = vmatprep.mubr.bf16.mxu1 %v7682_v1 }
 0x7b9   : > { %7566 = vmatprep.subr.msk.bf16.mxu1 %vm317_vm1, %v5967_v9 }
 0x7bf   : > { %6708 = vmatmul.mubr.msk.bf16.vlgmr.msra.gmra.mrb[20].mxu1 %vm310_vm0, %v7670_v15 }
 0x7c0   : > { %7099 = vmatpush3.bf16.msra.mxu1 %v5983_v16  ;;  %6027 = vmatprep.mubr.bf16.mxu1 %v7682_v1 }
 0x7c7   : > { %6709 = vmatmul.mubr.msk.bf16.gmra.mrb[24].mxu1 %vm310_vm0, %v7671_v17 }
 0x7c8   : > { %7100 = vmatprep.mubr.msk.bf16.mxu1 %vm310_vm0, %v7670_v15 }
 0x7ce   : > { %v8857_v18 = vpop.f32.mrb[6].mxu1 }
 0x7cf   : > { %7101 = vmatmul.mubr.msk.bf16.vlgmr.msra.gmra.mrb[28].mxu1 %vm310_vm0, %v7671_v17  ;;  %v8860_v19 = vpop.f32.mrb[7].mxu1 }
 0x892   : > { %v6019_v20 = vpop.f32.mrb[20].mxu1 }
 0x893   : > { %v6099_v21 = vadd.f32 %v6019_v20, %v8037_v37  ;;  %v6021_v22 = vpop.f32.mrb[21].mxu1 }
 0x894   : > { %v6100_v1 = vadd.f32 %v6021_v22, %v8037_v37  ;;  %v6023_v23 = vpop.f32.mrb[22].mxu1  ;;  %v7672_v22 = vld [vmem:[%s8921_s4 + $0x8] sm:$0xff] }
 0x895   : > { %v6111_v24 = vmax.f32 %v6099_v21, 0.0  ;;  %v6102_v25 = vadd.f32 %v6023_v23, %v8035_v36  ;;  %v6025_v26 = vpop.f32.mrb[23].mxu1 }
 0x896   : > { %v6112_v27 = vmax.f32 %v6100_v1, 0.0  ;;  %v6103_v30 = vadd.f32 %v6025_v26, %v8035_v36  ;;  %v7673_v1 = vld [vmem:[%s8921_s4] sm:$0xff] }
 0x897   : > { %v6123_v31 = vmul.f32 %v6111_v24, %v8045_v47  ;;  %v6114_v32 = vmax.f32 %v6102_v25, 0.0  ;;  %v3268_v23 = vadd.f32 %v7673_v1, %v8626_v29  ;;  %v4748_v29 = vadd.f32 %v7673_v1, %v8860_v19 }
 0x898   : > { %v6124_v33 = vmul.f32 %v6112_v27, %v8052_v52  ;;  %v6115_v34 = vmax.f32 %v6103_v30, 0.0 }
 0x899   : > { %v6126_v35 = vmul.f32 %v6114_v32, %v8045_v47  ;;  %6610 = vst.msk [vmem:[%s8390_s27 + $0x10] sm:$0xff] %vm1802_vm12, %v4748_v29 }
 0x89a   : > { %v6135_v38 = vadd.f32 %v6124_v33, %v6123_v31  ;;  %v6127_v39 = vmul.f32 %v6115_v34, %v8052_v52  ;;  %v6029_v40 = vpop.f32.mrb[24].mxu1  ;;  %v4753_v31 = vadd.f32 %v7672_v22, %v8857_v18 }
 0x89b   : > { %v6105_v41 = vadd.f32 %v6029_v40, %v8049_v50  ;;  %v6031_v42 = vpop.f32.mrb[25].mxu1 }
 0x89c   : > { %v6140_v43 = vadd.f32 %v6127_v39, %v6126_v35  ;;  %v6106_v44 = vadd.f32 %v6031_v42, %v8049_v50  ;;  %v6033_v51 = vpop.f32.mrb[26].mxu1  ;;  %6611 = vst.msk [vmem:[%s8390_s27 + $0x18] sm:$0xff] %vm1802_vm12, %v4753_v31 }
 0x89d   : > { %v6117_v45 = vmax.f32 %v6105_v41, 0.0  ;;  %v6108_v46 = vadd.f32 %v6033_v51, %v8055_v58  ;;  %v6035_v48 = vpop.f32.mrb[27].mxu1 }
 0x89e   : > { %v6118_v53 = vmax.f32 %v6106_v44, 0.0  ;;  %v6109_v54 = vadd.f32 %v6035_v48, %v8055_v58 }
 0x89f   : > { %v6129_v55 = vmul.f32 %v6117_v45, %v8045_v47  ;;  %v6120_v56 = vmax.f32 %v6108_v46, 0.0 }
 0x8a0   : > { %v6130_v57 = vmul.f32 %v6118_v53, %v8052_v52  ;;  %v6121_v59 = vmax.f32 %v6109_v54, 0.0 }
 0x8a1   : > { %v6132_v60 = vmul.f32 %v6120_v56, %v8045_v47 }
 0x8a2   : > { %v6145_v61 = vadd.f32 %v6130_v57, %v6129_v55  ;;  %v6133_v62 = vmul.f32 %v6121_v59, %v8052_v52  ;;  %v7102_v0 = vpop.f32.mrb[28].mxu1 }
 0x8a3   : > { %v6107_v2 = vadd.f32 %v7102_v0, %v8049_v50  ;;  %v6072_v3 = vpop.f32.mrb[29].mxu1 }
 0x8a4   : > { %v6150_v4 = vadd.f32 %v6133_v62, %v6132_v60  ;;  %v6101_v5 = vadd.f32 %v6072_v3, %v8037_v37  ;;  %v7103_v6 = vpop.f32.mrb[30].mxu1 }
 0x8a5   : > { %v6119_v7 = vmax.f32 %v6107_v2, 0.0  ;;  %v6110_v8 = vadd.f32 %v7103_v6, %v8055_v58  ;;  %v6075_v9 = vpop.f32.mrb[31].mxu1 }
 0x8a6   : > { %v6113_v10 = vmax.f32 %v6101_v5, 0.0  ;;  %v6104_v11 = vadd.f32 %v6075_v9, %v8035_v36 }
 0x8a7   : > { %v6131_v47 = vmul.f32 %v6119_v7, %v8047_v49  ;;  %v6122_v12 = vmax.f32 %v6110_v8, 0.0 }
 0x8a8   : > { %v6125_v52 = vmul.f32 %v6113_v10, %v8047_v49  ;;  %v6116_v13 = vmax.f32 %v6104_v11, 0.0 }
 0x8a9   : > { %v6134_v50 = vmul.f32 %v6122_v12, %v8047_v49  ;;  %v6146_v14 = vsel %vm1700_vm10, %v6131_v47, 0.0 }
 0x8aa   : > { %v6128_v37 = vmul.f32 %v6116_v13, %v8047_v49  ;;  %v6136_v15 = vsel %vm1700_vm10, %v6125_v52, 0.0  ;;  %v6147_v16 = vadd.f32 %v6146_v14, %v6145_v61  ;;  %v3273_v49 = vadd.f32 %v7672_v22, %v8623_v28 }
 0x8ab   : > { %v6137_v58 = vadd.f32 %v6136_v15, %v6135_v38  ;;  %v6151_v17 = vsel %vm1700_vm10, %v6134_v50, 0.0 }
 0x8ac   : > { %v6141_v36 = vsel %vm1700_vm10, %v6128_v37, 0.0  ;;  %v6152_v20 = vadd.f32 %v6151_v17, %v6150_v4 }
 0x8ad   : > { %6138 = vadd.xlane.f32.xlu1 %v6137_v58  ;;  %v6142_v21 = vadd.f32 %v6141_v36, %v6140_v43 }
 0x8af   : > { %6143 = vadd.xlane.f32.xlu0 %v6142_v21 }
 0x8b1   : > { %6153 = vadd.xlane.f32.xlu1 %v6152_v20 }
 0x8b3   : > { %6148 = vadd.xlane.f32.xlu0 %v6147_v16 }
 0x8c2   : > { %3280 = vrot.lane.b32.xlu1 %v3273_v49, %s7691_s9 }
 0x8c9   : > { %3278 = vrot.lane.b32.xlu0 %v3268_v23, %s7691_s9 }
 0x93a   : > { %v6139_v24 = vpop.xlane.xlu1 %6138 }
 0x93c   : > { %v6144_v25 = vpop.xlane.xlu0 %6143 }
 0x93d   : > { %v7139_v26 = vpack.c.bf16 %v6144_v25, %v6139_v24 }
 0x93e   : > { %v6154_v27 = vpop.xlane.xlu1 %6153 }
 0x93f   : > { %7140 = vmatprep.subr.bf16.mxu0 %v7139_v26 }
 0x940   : > { %7142 = vmatpush3.bf16.msra.mxu0 %v7139_v26  ;;  %v6149_v28 = vpop.xlane.xlu0 %6148 }
 0x941   : > { %v7143_v30 = vpack.c.bf16 %v6154_v27, %v6149_v28 }
 0x942   : > { %v3281_v32 = vpop.permute.xlu1 %3280 }
 0x943   : > { %3286 = vst.msk [vmem:[%s8390_s27 + $0x8] sm:$0xff] %vm3284_vm13, %v3281_v32  ;;  %7144 = vmatprep.subr.bf16.mxu0 %v7143_v30 }
 0x944   : > { %7146 = vmatpush3.bf16.msra.mxu0 %v7143_v30  ;;  %v3279_v33 = vpop.permute.xlu0 %3278 }
 0x945   : > { %3285 = vst.msk [vmem:[%s8390_s27] sm:$0xff] %vm3284_vm13, %v3279_v33 }
 0x947   : > { %7113 = vmatmul.mubr.msk.f32.vlgmr.msra.gmra.mrb[22].mxu0 %vm1720_vm11, %v8133_v63 }
 0xa1a   : > { %v7114_v18 = vpop.f32.mrb[22].mxu0 }
 0xa1b   : > { %v6227_v34 = vadd.f32 %v7672_v22, %v7114_v18  ;;  %v6221_v35 = vpop.f32.mrb[23].mxu0 }
 0xa1c   : > { %v6222_v38 = vadd.f32 %v7673_v1, %v6221_v35 }
 0xa1d   : > { %6234 = vrot.lane.b32.xlu0 %v6227_v34, %s7691_s9 }
 0xa1e   : > { %6232 = vrot.lane.b32.xlu1 %v6222_v38, %s7691_s9 }
 0xa8f   : > { %v6235_v39 = vpop.permute.xlu0 %6234 }
 0xa90   : > { %v6233_v19 = vpop.permute.xlu1 %6232  ;;  %6715 = vst.msk [vmem:[%s8390_s27 + $0x18] sm:$0xff] %vm3284_vm13, %v6235_v39 }
 0xa91   : > { %6714 = vst.msk [vmem:[%s8390_s27 + $0x10] sm:$0xff] %vm3284_vm13, %v6233_v19 }
 0xa92 PF: > { %s16_s21 = sadd.s32 1, %s7680_s21  }
 0xa93   : > { %p13_p4 = scmp.ge.s32.totalorder %s16_s21, 6  }
 0xa95   :  { %15 = sbr.rel (!%p13_p4) target bundleno = 1 (0x1), region = 84 }

</bundles_post_ra>
